<compile_context>
chip_gen: v5e
topology: v5e:2x2
jax: 0.10.0
libtpu: 0.0.40
codegen_flags: <defaults>
</compile_context>

<pallas_src>
import functools

import jax
import jax.numpy as jnp
from jax.experimental import pallas as pl
from jax.experimental.pallas import tpu as pltpu

SCALING_FACTOR = 10.0
DROPOUT_P = 0.1
_KEEP_SCALE = 1.0 / (1.0 - DROPOUT_P)
# drop iff hash < p * 2^32  (integer-domain threshold)
_DROP_THRESHOLD_U32 = int(round(DROPOUT_P * (1 << 32))) & 0xFFFFFFFF


def _sdp_kernel(seed_ref, q_ref, k_ref, o_ref, *, seq_len):
    # q_ref: (Bt, TQ, D)   k_ref: (Bt, S, D)   o_ref: (Bt, TQ, S)
    bi = pl.program_id(0)
    qi = pl.program_id(1)

    bt, tq, _ = q_ref.shape
    s_keys = k_ref.shape[1]

    # Fold 1/scaling into the (smaller) q operand before the matmul.
    q = q_ref[...].astype(jnp.float32) * (1.0 / SCALING_FACTOR)
    k = k_ref[...].astype(jnp.float32)

    # Batched MXU matmul, contracting on D (no explicit transpose of k).
    s = jnp.einsum("bqd,bkd->bqk", q, k, preferred_element_type=jnp.float32)

    # Numerically stable softmax over the key axis.
    m = jnp.max(s, axis=-1, keepdims=True)
    e = jnp.exp(s - m)
    denom = jnp.sum(e, axis=-1, keepdims=True)
    # Fold the dropout survivor scale 1/(1-p) into the tiny (Bt, TQ, 1) factor.
    inv = _KEEP_SCALE / denom

    # ---- dropout via counter-based hash on the global element index ----------
    # TODO(synk): torch's native dropout RNG stream cannot be reproduced; this is
    # an independent deterministic stream keyed by (seed, b, row, col).
    shape = (bt, tq, s_keys)
    b_idx = jax.lax.broadcasted_iota(jnp.int32, shape, 0) + bi * bt
    r_idx = jax.lax.broadcasted_iota(jnp.int32, shape, 1) + qi * tq
    c_idx = jax.lax.broadcasted_iota(jnp.int32, shape, 2)
    lin = (b_idx * seq_len + r_idx) * seq_len + c_idx + seed_ref[0]
    x = lin.astype(jnp.uint32)
    # splitmix32-style finalizer (pure integer VPU work, no float conversion)
    x = x ^ (x >> 16)
    x = x * jnp.uint32(0x7FEB352D)
    x = x ^ (x >> 15)
    x = x * jnp.uint32(0x846CA68B)
    x = x ^ (x >> 16)
    keep = x >= jnp.uint32(_DROP_THRESHOLD_U32)

    out = jnp.where(keep, e * inv, 0.0)
    o_ref[...] = out.astype(o_ref.dtype)


def sdp_attention_probs(q, k, seed=0, *, vmem_budget_bytes=12 * 1024 * 1024):
    B, S, D = q.shape
    assert k.shape == (B, S, D)

    bytes_f32 = 4

    def step_bytes(bt, tq):
        # double-buffered q, k and output tiles per grid step
        return 2 * bytes_f32 * (bt * tq * D + bt * S * D + bt * tq * S)

    # Query tile: full S when it fits, otherwise halve (stays a multiple of 8).
    tq = S
    while step_bytes(1, tq) > vmem_budget_bytes and tq % 16 == 0:
        tq //= 2

    # Batch elements per step: largest divisor of B that fits the budget.
    bt = 1
    for cand in range(min(B, 8), 0, -1):
        if B % cand == 0 and step_bytes(cand, tq) <= vmem_budget_bytes:
            bt = cand
            break

    grid = (B // bt, S // tq)
    seed_arr = jnp.asarray([seed], dtype=jnp.int32)
    kernel = functools.partial(_sdp_kernel, seq_len=S)

    return pl.pallas_call(
        kernel,
        out_shape=jax.ShapeDtypeStruct((B, S, S), q.dtype),
        grid_spec=pltpu.PrefetchScalarGridSpec(
            num_scalar_prefetch=1,
            grid=grid,
            in_specs=[
                pl.BlockSpec((bt, tq, D), lambda b, r, seed: (b, r, 0)),
                # K block is the same for every query tile -> stays resident.
                pl.BlockSpec((bt, S, D), lambda b, r, seed: (b, 0, 0)),
            ],
            out_specs=pl.BlockSpec((bt, tq, S), lambda b, r, seed: (b, r, 0)),
        ),
        compiler_params=pltpu.CompilerParams(
            dimension_semantics=("parallel", "parallel"),
        ),
    )(seed_arr, q, k)


if __name__ == "__main__":
    key = jax.random.PRNGKey(0)
    kq, kk = jax.random.split(key)

    B, S, D = 2, 128, 64
    q = jax.random.normal(kq, (B, S, D), dtype=jnp.float32)
    k = jax.random.normal(kk, (B, S, D), dtype=jnp.float32)

    out = jax.block_until_ready(sdp_attention_probs(q, k, seed=0))

    # sanity: shape / finiteness
    assert out.shape == (B, S, S)
    assert bool(jnp.all(jnp.isfinite(out)))

    # reference pre-dropout probabilities
    scores = jnp.einsum("bqd,bkd->bqk", q, k) / SCALING_FACTOR
    ref = jax.nn.softmax(scores, axis=-1)

    kept = out > 0
    keep_rate = float(jnp.mean(kept))
    assert 0.80 < keep_rate < 0.97, f"unexpected keep rate {keep_rate}"

    # surviving entries must equal softmax probs scaled by 1/(1-p)
    err = jnp.where(kept, jnp.abs(out * (1.0 - DROPOUT_P) - ref), 0.0)
    assert float(jnp.max(err)) < 1e-4, float(jnp.max(err))

    print("KERNEL_OK")
</pallas_src>

<mosaic_0001>
module attributes {stable_mosaic.version = 11 : i64} {
  func.func @_sdp_kernel(%arg0: i32, %arg1: i32, %arg2: memref<1xi32, #tpu.memory_space<smem>>, %arg3: memref<2x128x64xf32, #tpu.memory_space<vmem>>, %arg4: memref<2x128x64xf32, #tpu.memory_space<vmem>>, %arg5: memref<2x128x128xf32, #tpu.memory_space<vmem>>) attributes {dimension_semantics = [#tpu.dimension_semantics<parallel>, #tpu.dimension_semantics<parallel>], iteration_bounds = array<i64: 1, 1>, scalar_prefetch = 1 : i64, scratch_operands = 0 : i64, tpu.core_type = #tpu.core_type<tc>, window_params = [{transform_indices = @transform_0, window_bounds = array<i64: 2, 128, 64>}, {transform_indices = @transform_1, window_bounds = array<i64: 2, 128, 64>}, {transform_indices = @transform_2, window_bounds = array<i64: 2, 128, 128>}]} {
    %c0 = arith.constant 0 : index
    %c0_0 = arith.constant 0 : index
    %c0_1 = arith.constant 0 : index
    %0 = vector.load %arg3[%c0, %c0_0, %c0_1] : memref<2x128x64xf32, #tpu.memory_space<vmem>>, vector<2x128x64xf32>
    %cst = arith.constant 1.000000e-01 : f32
    %1 = vector.broadcast %cst : f32 to vector<2x128x64xf32>
    %2 = arith.mulf %0, %1 : vector<2x128x64xf32>
    %c0_2 = arith.constant 0 : index
    %c0_3 = arith.constant 0 : index
    %c0_4 = arith.constant 0 : index
    %3 = vector.load %arg4[%c0_2, %c0_3, %c0_4] : memref<2x128x64xf32, #tpu.memory_space<vmem>>, vector<2x128x64xf32>
    "tpu.trace_start"() <{level = 10 : i32, message = "bqd,bkd->bqk"}> : () -> ()
    %cst_5 = arith.constant dense<0.000000e+00> : vector<2x128x128xf32>
    %4 = tpu.matmul %2, %3, %cst_5 {dimension_numbers = #tpu.dot_dimension_numbers<[2], [2], [1], [1], [0, 0, 0, 1, 1, 1], [0], [0]>} : vector<2x128x64xf32>, vector<2x128x64xf32>, vector<2x128x128xf32> -> vector<2x128x128xf32>
    "tpu.trace_stop"() : () -> ()
    %cst_6 = arith.constant dense<0xFF800000> : vector<2x128xf32>
    %5 = vector.multi_reduction <maximumf>, %4, %cst_6 [2] : vector<2x128x128xf32> to vector<2x128xf32>
    %6 = vector.shape_cast %5 : vector<2x128xf32> to vector<2x128x1xf32>
    %7 = vector.broadcast %6 : vector<2x128x1xf32> to vector<2x128x128xf32>
    %8 = arith.subf %4, %7 : vector<2x128x128xf32>
    %9 = math.exp %8 : vector<2x128x128xf32>
    %cst_7 = arith.constant dense<0.000000e+00> : vector<2x128xf32>
    %10 = vector.multi_reduction <add>, %9, %cst_7 [2] : vector<2x128x128xf32> to vector<2x128xf32>
    %11 = vector.shape_cast %10 : vector<2x128xf32> to vector<2x128x1xf32>
    %cst_8 = arith.constant 1.11111116 : f32
    %12 = vector.broadcast %cst_8 : f32 to vector<2x128x1xf32>
    %13 = arith.divf %12, %11 : vector<2x128x1xf32>
    %14 = tpu.iota {dimensions = array<i32: 0>} : vector<2x128x128xi32>
    %c2_i32 = arith.constant 2 : i32
    %15 = arith.muli %arg0, %c2_i32 : i32
    %16 = vector.broadcast %15 : i32 to vector<2x128x128xi32>
    %17 = arith.addi %14, %16 : vector<2x128x128xi32>
    %18 = tpu.iota {dimensions = array<i32: 1>} : vector<2x128x128xi32>
    %c128_i32 = arith.constant 128 : i32
    %19 = arith.muli %arg1, %c128_i32 : i32
    %20 = vector.broadcast %19 : i32 to vector<2x128x128xi32>
    %21 = arith.addi %18, %20 : vector<2x128x128xi32>
    %22 = tpu.iota {dimensions = array<i32: 2>} : vector<2x128x128xi32>
    %c128_i32_9 = arith.constant 128 : i32
    %23 = vector.broadcast %c128_i32_9 : i32 to vector<2x128x128xi32>
    %24 = arith.muli %17, %23 : vector<2x128x128xi32>
    %25 = arith.addi %24, %21 : vector<2x128x128xi32>
    %c128_i32_10 = arith.constant 128 : i32
    %26 = vector.broadcast %c128_i32_10 : i32 to vector<2x128x128xi32>
    %27 = arith.muli %25, %26 : vector<2x128x128xi32>
    %28 = arith.addi %27, %22 : vector<2x128x128xi32>
    %c0_11 = arith.constant 0 : index
    %29 = memref.load %arg2[%c0_11] : memref<1xi32, #tpu.memory_space<smem>>
    %30 = vector.broadcast %29 : i32 to vector<2x128x128xi32>
    %31 = arith.addi %28, %30 : vector<2x128x128xi32>
    %c16_i32 = arith.constant 16 : i32
    %32 = vector.broadcast %c16_i32 : i32 to vector<2x128x128xi32>
    %33 = arith.shrui %31, %32 : vector<2x128x128xi32>
    %34 = arith.xori %31, %33 : vector<2x128x128xi32>
    %c2146121005_i32 = arith.constant 2146121005 : i32
    %35 = vector.broadcast %c2146121005_i32 : i32 to vector<2x128x128xi32>
    %36 = arith.muli %34, %35 : vector<2x128x128xi32>
    %c15_i32 = arith.constant 15 : i32
    %37 = vector.broadcast %c15_i32 : i32 to vector<2x128x128xi32>
    %38 = arith.shrui %36, %37 : vector<2x128x128xi32>
    %39 = arith.xori %36, %38 : vector<2x128x128xi32>
    %c-2073254261_i32 = arith.constant -2073254261 : i32
    %40 = vector.broadcast %c-2073254261_i32 : i32 to vector<2x128x128xi32>
    %41 = arith.muli %39, %40 : vector<2x128x128xi32>
    %c16_i32_12 = arith.constant 16 : i32
    %42 = vector.broadcast %c16_i32_12 : i32 to vector<2x128x128xi32>
    %43 = arith.shrui %41, %42 : vector<2x128x128xi32>
    %44 = arith.xori %41, %43 : vector<2x128x128xi32>
    %c429496730_i32 = arith.constant 429496730 : i32
    %45 = vector.broadcast %c429496730_i32 : i32 to vector<2x128x128xi32>
    %46 = arith.cmpi uge, %44, %45 : vector<2x128x128xi32>
    %47 = vector.broadcast %13 : vector<2x128x1xf32> to vector<2x128x128xf32>
    %48 = arith.mulf %9, %47 : vector<2x128x128xf32>
    %cst_13 = arith.constant 0.000000e+00 : f32
    %49 = vector.broadcast %cst_13 : f32 to vector<2x128x128xf32>
    %50 = arith.select %46, %48, %49 : vector<2x128x128xi1>, vector<2x128x128xf32>
    %c0_14 = arith.constant 0 : index
    %c0_15 = arith.constant 0 : index
    %c0_16 = arith.constant 0 : index
    %51 = vector.load %arg5[%c0_14, %c0_15, %c0_16] : memref<2x128x128xf32, #tpu.memory_space<vmem>>, vector<2x128x128xf32>
    tpu.vector_store %arg5[%c0_14, %c0_15, %c0_16], %50 {strides = array<i32>} : memref<2x128x128xf32, #tpu.memory_space<vmem>>, vector<2x128x128xf32>,
    return
  }
  func.func @transform_0(%arg0: i32, %arg1: i32, %arg2: memref<1xi32, #tpu.memory_space<smem>>) -> (i32, i32, i32) {
    %c0_i32 = arith.constant 0 : i32
    %c0_i32_0 = arith.constant 0 : i32
    return %arg0, %arg1, %c0_i32 : i32, i32, i32
  }
  func.func @transform_1(%arg0: i32, %arg1: i32, %arg2: memref<1xi32, #tpu.memory_space<smem>>) -> (i32, i32, i32) {
    %c0_i32 = arith.constant 0 : i32
    %c0_i32_0 = arith.constant 0 : i32
    %c0_i32_1 = arith.constant 0 : i32
    return %arg0, %c0_i32, %c0_i32_0 : i32, i32, i32
  }
  func.func @transform_2(%arg0: i32, %arg1: i32, %arg2: memref<1xi32, #tpu.memory_space<smem>>) -> (i32, i32, i32) {
    %c0_i32 = arith.constant 0 : i32
    %c0_i32_0 = arith.constant 0 : i32
    return %arg0, %arg1, %c0_i32 : i32, i32, i32
  }
}

</mosaic_0001>

<bundles_post_ra>
// kernel: tpu_custom_call.1
= control target key start
LH: loop header
LB: loop body
LE: loop exit
PB: predicated region body
PF: predicated region fallthrough
CT: control target
= control target key end

     0   :  { %vm110_vm0 = vcmask 523264   ;;  %s3283_s0 = inlined_call_operand.<no memory space> [shape: s32[1], index: 0, kind: input, shape index: {}]   ;;  %s3284_s1 = inlined_call_operand.vmem [shape: f32[2,128,64], index: 1, kind: input, shape index: {}]   ;;  %s3285_s2 = inlined_call_operand.vmem [shape: f32[2,128,64], index: 2, kind: input, shape index: {}]   ;;  %s3286_s3 = inlined_call_operand.hbm [shape: f32[2,128,128], index: 3, kind: output, shape index: {}]  }
   0x1   :  { %v93_v0 = vld [vmem:[%s3285_s2 + $0x78] sm:$0xff]  ;;  %v92_v2 = vld [vmem:[%s3285_s2 + $0x70] sm:$0xff]  ;;  %v91_v4 = vld [vmem:[%s3285_s2 + $0x68] sm:$0xff] }
   0x2   :  { %v109_v1 = vld [vmem:[%s3285_s2 + $0xf8] sm:$0xff]  ;;  %1775 = vmatpush.xpose.msk.msra.mxu0 %vm110_vm0, %v93_v0  ;;  %1871 = vmatpush.xpose.msk.msra.mxu2 %vm110_vm0, %v93_v0  ;;  %v108_v3 = vld [vmem:[%s3285_s2 + $0xf0] sm:$0xff]  ;;  %v107_v5 = vld [vmem:[%s3285_s2 + $0xe8] sm:$0xff] }
   0x3   :  { %1807 = vmatpush.xpose.msk.msra.mxu1 %vm110_vm0, %v109_v1  ;;  %1887 = vmatpush.xpose.msk.msra.mxu3 %vm110_vm0, %v109_v1 }
   0x6   :  { %1776 = vmatpush.xpose.msk.msra.mxu0 %vm110_vm0, %v92_v2  ;;  %1872 = vmatpush.xpose.msk.msra.mxu2 %vm110_vm0, %v92_v2 }
   0x7   :  { %1808 = vmatpush.xpose.msk.msra.mxu1 %vm110_vm0, %v108_v3  ;;  %1888 = vmatpush.xpose.msk.msra.mxu3 %vm110_vm0, %v108_v3 }
   0x8   :  { %9 = vsyncpa [#allocation5], 0  ;;  %v90_v6 = vld [vmem:[%s3285_s2 + $0x60] sm:$0xff]  ;;  %v89_v8 = vld [vmem:[%s3285_s2 + $0x58] sm:$0xff]  ;;  %s1763_s6 = sshll.u32 %s3286_s3, 4  ;;  %s2061_s7 = smov 128   ;;  %s1764_s6 = int_to_ptr.hbm [resolvable:$true] %s1763_s6 }
   0x9   :  { %v106_v7 = vld [vmem:[%s3285_s2 + $0xe0] sm:$0xff]  ;;  %v105_v9 = vld [vmem:[%s3285_s2 + $0xd8] sm:$0xff]  ;;  %v88_v10 = vld [vmem:[%s3285_s2 + $0x50] sm:$0xff]  ;;  %s2062_s8 = smov 8  }
   0xa   :  { %1777 = vmatpush.xpose.msk.msra.mxu0 %vm110_vm0, %v91_v4  ;;  %1873 = vmatpush.xpose.msk.msra.mxu2 %vm110_vm0, %v91_v4  ;;  %v104_v11 = vld [vmem:[%s3285_s2 + $0xd0] sm:$0xff]  ;;  %v87_v12 = vld [vmem:[%s3285_s2 + $0x48] sm:$0xff]  ;;  %v86_v14 = vld [vmem:[%s3285_s2 + $0x40] sm:$0xff] }
   0xb   :  { %1809 = vmatpush.xpose.msk.msra.mxu1 %vm110_vm0, %v107_v5  ;;  %1889 = vmatpush.xpose.msk.msra.mxu3 %vm110_vm0, %v107_v5  ;;  %v103_v13 = vld [vmem:[%s3285_s2 + $0xc8] sm:$0xff]  ;;  %v102_v15 = vld [vmem:[%s3285_s2 + $0xc0] sm:$0xff]  ;;  %v85_v16 = vld [vmem:[%s3285_s2 + $0x38] sm:$0xff] }
   0xc   :  { %v101_v17 = vld [vmem:[%s3285_s2 + $0xb8] sm:$0xff]  ;;  %v84_v18 = vld [vmem:[%s3285_s2 + $0x30] sm:$0xff]  ;;  %v83_v20 = vld [vmem:[%s3285_s2 + $0x28] sm:$0xff] }
   0xd   :  { %v100_v19 = vld [vmem:[%s3285_s2 + $0xb0] sm:$0xff]  ;;  %v99_v21 = vld [vmem:[%s3285_s2 + $0xa8] sm:$0xff]  ;;  %v82_v22 = vld [vmem:[%s3285_s2 + $0x20] sm:$0xff] }
   0xe   :  { %1778 = vmatpush.xpose.msk.msra.mxu0 %vm110_vm0, %v90_v6  ;;  %1874 = vmatpush.xpose.msk.msra.mxu2 %vm110_vm0, %v90_v6  ;;  %v98_v23 = vld [vmem:[%s3285_s2 + $0xa0] sm:$0xff]  ;;  %v81_v24 = vld [vmem:[%s3285_s2 + $0x18] sm:$0xff]  ;;  %v80_v26 = vld [vmem:[%s3285_s2 + $0x10] sm:$0xff] }
   0xf   :  { %1810 = vmatpush.xpose.msk.msra.mxu1 %vm110_vm0, %v106_v7  ;;  %1890 = vmatpush.xpose.msk.msra.mxu3 %vm110_vm0, %v106_v7  ;;  %v97_v25 = vld [vmem:[%s3285_s2 + $0x98] sm:$0xff]  ;;  %v96_v27 = vld [vmem:[%s3285_s2 + $0x90] sm:$0xff]  ;;  %v79_v28 = vld [vmem:[%s3285_s2 + $0x8] sm:$0xff] }
  0x10   :  { %v95_v29 = vld [vmem:[%s3285_s2 + $0x88] sm:$0xff]  ;;  %v14_v30 = vld [vmem:[%s3284_s1] sm:$0xff]  ;;  %v24_v48 = vld [vmem:[%s3284_s1 + $0x50] sm:$0xff] }
  0x11   :  { %v22_v31 = vld [vmem:[%s3284_s1 + $0x40] sm:$0xff]  ;;  %v46_v36 = vmul.f32 0.1, %v14_v30  ;;  %v23_v40 = vld [vmem:[%s3284_s1 + $0x48] sm:$0xff]  ;;  %v16_v49 = vld [vmem:[%s3284_s1 + $0x10] sm:$0xff] }
  0x12   :  { %1779 = vmatpush.xpose.msk.msra.mxu0 %vm110_vm0, %v89_v8  ;;  %1875 = vmatpush.xpose.msk.msra.mxu2 %vm110_vm0, %v89_v8  ;;  %v78_v32 = vld [vmem:[%s3285_s2] sm:$0xff]  ;;  %v54_v37 = vmul.f32 0.1, %v22_v31  ;;  %v15_v41 = vld [vmem:[%s3284_s1 + $0x8] sm:$0xff]  ;;  %v55_v44 = vmul.f32 0.1, %v23_v40 }
  0x13   :  { %1811 = vmatpush.xpose.msk.msra.mxu1 %vm110_vm0, %v105_v9  ;;  %1891 = vmatpush.xpose.msk.msra.mxu3 %vm110_vm0, %v105_v9  ;;  %v30_v33 = vld [vmem:[%s3284_s1 + $0x80] sm:$0xff]  ;;  %v39_v42 = vld [vmem:[%s3284_s1 + $0xc8] sm:$0xff]  ;;  %v47_v45 = vmul.f32 0.1, %v15_v41  ;;  %v40_v50 = vld [vmem:[%s3284_s1 + $0xd0] sm:$0xff] }
  0x14   :  { %v38_v34 = vld [vmem:[%s3284_s1 + $0xc0] sm:$0xff]  ;;  %v62_v38 = vmul.f32 0.1, %v30_v33  ;;  %v31_v43 = vld [vmem:[%s3284_s1 + $0x88] sm:$0xff]  ;;  %v71_v46 = vmul.f32 0.1, %v39_v42 }
  0x15   :  { %v94_v35 = vld [vmem:[%s3285_s2 + $0x80] sm:$0xff]  ;;  %v70_v39 = vmul.f32 0.1, %v38_v34  ;;  %v63_v47 = vmul.f32 0.1, %v31_v43  ;;  %v32_v51 = vld [vmem:[%s3284_s1 + $0x90] sm:$0xff] }
  0x16   :  { %1780 = vmatpush.xpose.msk.msra.mxu0 %vm110_vm0, %v88_v10  ;;  %1876 = vmatpush.xpose.msk.msra.mxu2 %vm110_vm0, %v88_v10  ;;  %v56_v52 = vmul.f32 0.1, %v24_v48  ;;  %v48_v53 = vmul.f32 0.1, %v16_v49  ;;  %v72_v54 = vmul.f32 0.1, %v40_v50 }
  0x17   :  { %1812 = vmatpush.xpose.msk.msra.mxu1 %vm110_vm0, %v104_v11  ;;  %1892 = vmatpush.xpose.msk.msra.mxu3 %vm110_vm0, %v104_v11  ;;  %v64_v55 = vmul.f32 0.1, %v32_v51  ;;  %v25_v56 = vld [vmem:[%s3284_s1 + $0x58] sm:$0xff]  ;;  %v18_v0 = vld [vmem:[%s3284_s1 + $0x20] sm:$0xff]  ;;  %v19_v8 = vld [vmem:[%s3284_s1 + $0x28] sm:$0xff] }
  0x18   :  { %v17_v57 = vld [vmem:[%s3284_s1 + $0x18] sm:$0xff]  ;;  %v57_v60 = vmul.f32 0.1, %v25_v56  ;;  %v26_v1 = vld [vmem:[%s3284_s1 + $0x60] sm:$0xff]  ;;  %v50_v4 = vmul.f32 0.1, %v18_v0 }
  0x19   :  { %v41_v58 = vld [vmem:[%s3284_s1 + $0xd8] sm:$0xff]  ;;  %v49_v61 = vmul.f32 0.1, %v17_v57  ;;  %v34_v2 = vld [vmem:[%s3284_s1 + $0xa0] sm:$0xff]  ;;  %v58_v5 = vmul.f32 0.1, %v26_v1 }
  0x1a   :  { %1781 = vmatpush.xpose.msk.msra.mxu0 %vm110_vm0, %v87_v12  ;;  %1877 = vmatpush.xpose.msk.msra.mxu2 %vm110_vm0, %v87_v12  ;;  %v33_v59 = vld [vmem:[%s3284_s1 + $0x98] sm:$0xff]  ;;  %v73_v62 = vmul.f32 0.1, %v41_v58  ;;  %v42_v3 = vld [vmem:[%s3284_s1 + $0xe0] sm:$0xff]  ;;  %v66_v6 = vmul.f32 0.1, %v34_v2 }
  0x1b   :  { %1813 = vmatpush.xpose.msk.msra.mxu1 %vm110_vm0, %v103_v13  ;;  %1893 = vmatpush.xpose.msk.msra.mxu3 %vm110_vm0, %v103_v13  ;;  %v65_v63 = vmul.f32 0.1, %v33_v59  ;;  %v74_v7 = vmul.f32 0.1, %v42_v3  ;;  %v27_v9 = vld [vmem:[%s3284_s1 + $0x68] sm:$0xff] }
  0x1c   :  { %v35_v10 = vld [vmem:[%s3284_s1 + $0xa8] sm:$0xff]  ;;  %v51_v12 = vmul.f32 0.1, %v19_v8  ;;  %v59_v13 = vmul.f32 0.1, %v27_v9 }
  0x1d   :  { %v43_v11 = vld [vmem:[%s3284_s1 + $0xe8] sm:$0xff] }
  0x1e   :  { %1782 = vmatpush.xpose.msk.msra.mxu0 %vm110_vm0, %v86_v14  ;;  %1878 = vmatpush.xpose.msk.msra.mxu2 %vm110_vm0, %v86_v14  ;;  %v67_v14 = vmul.f32 0.1, %v35_v10 }
  0x1f   :  { %1814 = vmatpush.xpose.msk.msra.mxu1 %vm110_vm0, %v102_v15  ;;  %1894 = vmatpush.xpose.msk.msra.mxu3 %vm110_vm0, %v102_v15  ;;  %v75_v15 = vmul.f32 0.1, %v43_v11 }
  0x22   :  { %1783 = vmatpush.xpose.msk.msra.mxu0 %vm110_vm0, %v85_v16  ;;  %1879 = vmatpush.xpose.msk.msra.mxu2 %vm110_vm0, %v85_v16  ;;  %v20_v16 = vld [vmem:[%s3284_s1 + $0x30] sm:$0xff] }
  0x23   :  { %1815 = vmatpush.xpose.msk.msra.mxu1 %vm110_vm0, %v101_v17  ;;  %1895 = vmatpush.xpose.msk.msra.mxu3 %vm110_vm0, %v101_v17  ;;  %v28_v17 = vld [vmem:[%s3284_s1 + $0x70] sm:$0xff] }
  0x26   :  { %1784 = vmatpush.xpose.msk.msra.mxu0 %vm110_vm0, %v84_v18  ;;  %1880 = vmatpush.xpose.msk.msra.mxu2 %vm110_vm0, %v84_v18  ;;  %v44_v18 = vld [vmem:[%s3284_s1 + $0xf0] sm:$0xff] }
  0x27   :  { %1816 = vmatpush.xpose.msk.msra.mxu1 %vm110_vm0, %v100_v19  ;;  %1896 = vmatpush.xpose.msk.msra.mxu3 %vm110_vm0, %v100_v19  ;;  %v36_v19 = vld [vmem:[%s3284_s1 + $0xb0] sm:$0xff] }
  0x2a   :  { %1785 = vmatpush.xpose.msk.msra.mxu0 %vm110_vm0, %v83_v20  ;;  %1881 = vmatpush.xpose.msk.msra.mxu2 %vm110_vm0, %v83_v20  ;;  %v52_v20 = vmul.f32 0.1, %v20_v16 }
  0x2b   :  { %1817 = vmatpush.xpose.msk.msra.mxu1 %vm110_vm0, %v99_v21  ;;  %1897 = vmatpush.xpose.msk.msra.mxu3 %vm110_vm0, %v99_v21  ;;  %v60_v21 = vmul.f32 0.1, %v28_v17 }
  0x2e   :  { %1786 = vmatpush.xpose.msk.msra.mxu0 %vm110_vm0, %v82_v22  ;;  %1882 = vmatpush.xpose.msk.msra.mxu2 %vm110_vm0, %v82_v22  ;;  %v76_v22 = vmul.f32 0.1, %v44_v18 }
  0x2f   :  { %1818 = vmatpush.xpose.msk.msra.mxu1 %vm110_vm0, %v98_v23  ;;  %1898 = vmatpush.xpose.msk.msra.mxu3 %vm110_vm0, %v98_v23  ;;  %v68_v23 = vmul.f32 0.1, %v36_v19 }
  0x32   :  { %1787 = vmatpush.xpose.msk.msra.mxu0 %vm110_vm0, %v81_v24  ;;  %1883 = vmatpush.xpose.msk.msra.mxu2 %vm110_vm0, %v81_v24  ;;  %v29_v24 = vld [vmem:[%s3284_s1 + $0x78] sm:$0xff] }
  0x33   :  { %1819 = vmatpush.xpose.msk.msra.mxu1 %vm110_vm0, %v97_v25  ;;  %1899 = vmatpush.xpose.msk.msra.mxu3 %vm110_vm0, %v97_v25  ;;  %v21_v25 = vld [vmem:[%s3284_s1 + $0x38] sm:$0xff] }
  0x36   :  { %1788 = vmatpush.xpose.msk.msra.mxu0 %vm110_vm0, %v80_v26  ;;  %1884 = vmatpush.xpose.msk.msra.mxu2 %vm110_vm0, %v80_v26  ;;  %v37_v26 = vld [vmem:[%s3284_s1 + $0xb8] sm:$0xff] }
  0x37   :  { %1820 = vmatpush.xpose.msk.msra.mxu1 %vm110_vm0, %v96_v27  ;;  %1900 = vmatpush.xpose.msk.msra.mxu3 %vm110_vm0, %v96_v27  ;;  %v45_v27 = vld [vmem:[%s3284_s1 + $0xf8] sm:$0xff]  ;;  %v69_v30 = vmul.f32 0.1, %v37_v26 }
  0x38   :  { %v77_v31 = vmul.f32 0.1, %v45_v27 }
  0x3a   :  { %1789 = vmatpush.xpose.msk.msra.mxu0 %vm110_vm0, %v79_v28  ;;  %1885 = vmatpush.xpose.msk.msra.mxu2 %vm110_vm0, %v79_v28  ;;  %v61_v28 = vmul.f32 0.1, %v29_v24 }
  0x3b   :  { %1821 = vmatpush.xpose.msk.msra.mxu1 %vm110_vm0, %v95_v29  ;;  %1901 = vmatpush.xpose.msk.msra.mxu3 %vm110_vm0, %v95_v29  ;;  %v53_v29 = vmul.f32 0.1, %v21_v25 }
  0x3e   :  { %1790 = vmatpush.xpose.msk.msra.mxu0 %vm110_vm0, %v78_v32  ;;  %1886 = vmatpush.xpose.msk.msra.mxu2 %vm110_vm0, %v78_v32 }
  0x3f   :  { %1822 = vmatpush.xpose.msk.msra.mxu1 %vm110_vm0, %v94_v35  ;;  %1902 = vmatpush.xpose.msk.msra.mxu3 %vm110_vm0, %v94_v35 }
  0x41   :  { %1791 = vmatmul.msk.f32.vlgmr.msra.gmra.mxu0 %vm110_vm0, %v46_v36  ;;  %1799 = vmatmul.msk.f32.vlgmr.msra.gmra.mxu2 %vm110_vm0, %v54_v37 }
  0x42   :  { %1823 = vmatmul.msk.f32.vlgmr.msra.gmra.mxu1 %vm110_vm0, %v62_v38  ;;  %1831 = vmatmul.msk.f32.vlgmr.msra.gmra.mxu3 %vm110_vm0, %v70_v39 }
  0x49   :  { %1800 = vmatmul.msk.f32.gmra.mxu2 %vm110_vm0, %v55_v44  ;;  %1792 = vmatmul.msk.f32.gmra.mxu0 %vm110_vm0, %v47_v45 }
  0x4a   :  { %1832 = vmatmul.msk.f32.gmra.mxu3 %vm110_vm0, %v71_v46  ;;  %1824 = vmatmul.msk.f32.gmra.mxu1 %vm110_vm0, %v63_v47 }
  0x51   :  { %1801 = vmatmul.msk.f32.gmra.mxu2 %vm110_vm0, %v56_v52  ;;  %1793 = vmatmul.msk.f32.gmra.mxu0 %vm110_vm0, %v48_v53 }
  0x52   :  { %1833 = vmatmul.msk.f32.gmra.mxu3 %vm110_vm0, %v72_v54  ;;  %1825 = vmatmul.msk.f32.gmra.mxu1 %vm110_vm0, %v64_v55 }
  0x59   :  { %1802 = vmatmul.msk.f32.gmra.mxu2 %vm110_vm0, %v57_v60  ;;  %1794 = vmatmul.msk.f32.gmra.mxu0 %vm110_vm0, %v49_v61 }
  0x5a   :  { %1834 = vmatmul.msk.f32.gmra.mxu3 %vm110_vm0, %v73_v62  ;;  %1826 = vmatmul.msk.f32.gmra.mxu1 %vm110_vm0, %v65_v63 }
  0x61   :  { %1795 = vmatmul.msk.f32.gmra.mxu0 %vm110_vm0, %v50_v4  ;;  %1803 = vmatmul.msk.f32.gmra.mxu2 %vm110_vm0, %v58_v5 }
  0x62   :  { %1827 = vmatmul.msk.f32.gmra.mxu1 %vm110_vm0, %v66_v6  ;;  %1835 = vmatmul.msk.f32.gmra.mxu3 %vm110_vm0, %v74_v7 }
  0x69   :  { %1796 = vmatmul.msk.f32.gmra.mxu0 %vm110_vm0, %v51_v12  ;;  %1804 = vmatmul.msk.f32.gmra.mxu2 %vm110_vm0, %v59_v13 }
  0x6a   :  { %1828 = vmatmul.msk.f32.gmra.mxu1 %vm110_vm0, %v67_v14  ;;  %1836 = vmatmul.msk.f32.gmra.mxu3 %vm110_vm0, %v75_v15 }
  0x71   :  { %1797 = vmatmul.msk.f32.gmra.mxu0 %vm110_vm0, %v52_v20  ;;  %1805 = vmatmul.msk.f32.gmra.mxu2 %vm110_vm0, %v60_v21 }
  0x72   :  { %1837 = vmatmul.msk.f32.gmra.mxu3 %vm110_vm0, %v76_v22  ;;  %1829 = vmatmul.msk.f32.gmra.mxu1 %vm110_vm0, %v68_v23 }
  0x79   :  { %1806 = vmatmul.msk.f32.gmra.mxu2 %vm110_vm0, %v61_v28  ;;  %1798 = vmatmul.msk.f32.gmra.mxu0 %vm110_vm0, %v53_v29 }
  0x7a   :  { %1830 = vmatmul.msk.f32.gmra.mxu1 %vm110_vm0, %v69_v30  ;;  %1838 = vmatmul.msk.f32.gmra.mxu3 %vm110_vm0, %v77_v31 }
  0xbe   :  { %v2371_v32 = vpop.f32.mrf.mxu0 }
  0xbf   :  { %v2373_v33 = vpop.f32.mrf.mxu1  ;;  %433 = vmax.xlane.f32.xlu0 %v2371_v32 }
  0xc0   :  { %465 = vmax.xlane.f32.xlu1 %v2373_v33 }
  0xc4   :  { %v2377_v34 = vpop.f32.mrf.mxu2 }
  0xc5   :  { %v2379_v35 = vpop.f32.mrf.mxu3  ;;  %449 = vmax.xlane.f32.xlu2 %v2377_v34 }
  0xc6   :  { %v2382_v36 = vpop.f32.mrf.mxu0 }
  0xc7   :  { %481 = vmax.xlane.f32.xlu0 %v2379_v35  ;;  %v2385_v37 = vpop.f32.mrf.mxu1 }
  0xcc   :  { %v2387_v38 = vpop.f32.mrf.mxu2 }
  0xcd   :  { %v2389_v39 = vpop.f32.mrf.mxu3  ;;  %467 = vmax.xlane.f32.xlu2 %v2385_v37 }
  0xce   :  { %483 = vmax.xlane.f32.xlu1 %v2389_v39  ;;  %v2394_v40 = vpop.f32.mrf.mxu0 }
  0xcf   :  { %435 = vmax.xlane.f32.xlu0 %v2382_v36  ;;  %v2403_v43 = vpop.f32.mrf.mxu1 }
  0xd4   :  { %v2396_v41 = vpop.f32.mrf.mxu2 }
  0xd5   :  { %v2398_v42 = vpop.f32.mrf.mxu3 }
  0xd6   :  { %485 = vmax.xlane.f32.xlu2 %v2398_v42  ;;  %437 = vmax.xlane.f32.xlu1 %v2394_v40  ;;  %v2405_v44 = vpop.f32.mrf.mxu0 }
  0xd7   :  { %451 = vmax.xlane.f32.xlu0 %v2387_v38  ;;  %v2412_v46 = vpop.f32.mrf.mxu1 }
  0xdc   :  { %v2407_v45 = vpop.f32.mrf.mxu2 }
  0xdd   :  { %v2416_v48 = vpop.f32.mrf.mxu3 }
  0xde   :  { %455 = vmax.xlane.f32.xlu2 %v2407_v45  ;;  %453 = vmax.xlane.f32.xlu1 %v2396_v41  ;;  %v2414_v47 = vpop.f32.mrf.mxu0 }
  0xdf   :  { %469 = vmax.xlane.f32.xlu0 %v2403_v43  ;;  %v2421_v49 = vpop.f32.mrf.mxu1 }
  0xe4   :  { %v2423_v50 = vpop.f32.mrf.mxu2 }
  0xe5   :  { %v2428_v51 = vpop.f32.mrf.mxu3 }
  0xe6   :  { %439 = vmax.xlane.f32.xlu1 %v2405_v44  ;;  %441 = vmax.xlane.f32.xlu2 %v2414_v47  ;;  %v2430_v52 = vpop.f32.mrf.mxu0 }
  0xe7   :  { %487 = vmax.xlane.f32.xlu0 %v2416_v48  ;;  %v2432_v53 = vpop.f32.mrf.mxu1 }
  0xec   :  { %v2437_v54 = vpop.f32.mrf.mxu2 }
  0xed   :  { %v2439_v55 = vpop.f32.mrf.mxu3 }
  0xee   :  { %471 = vmax.xlane.f32.xlu1 %v2412_v46  ;;  %473 = vmax.xlane.f32.xlu2 %v2421_v49  ;;  %v2441_v56 = vpop.f32.mrf.mxu0 }
  0xef   :  { %457 = vmax.xlane.f32.xlu0 %v2423_v50  ;;  %v2446_v57 = vpop.f32.mrf.mxu1 }
  0xf4   :  { %v2448_v58 = vpop.f32.mrf.mxu2 }
  0xf5   :  { %v2450_v59 = vpop.f32.mrf.mxu3 }
  0xf6   :  { %489 = vmax.xlane.f32.xlu1 %v2428_v51  ;;  %443 = vmax.xlane.f32.xlu2 %v2430_v52  ;;  %v2455_v60 = vpop.f32.mrf.mxu0 }
  0xf7   :  { %475 = vmax.xlane.f32.xlu0 %v2432_v53  ;;  %v2457_v61 = vpop.f32.mrf.mxu1 }
  0xfc   :  { %v2459_v62 = vpop.f32.mrf.mxu2 }
  0xfd   :  { %v2464_v63 = vpop.f32.mrf.mxu3 }
  0xfe   :  { %459 = vmax.xlane.f32.xlu1 %v2437_v54  ;;  %491 = vmax.xlane.f32.xlu2 %v2439_v55 }
  0xff   :  { %445 = vmax.xlane.f32.xlu0 %v2441_v56 }
 0x106   :  { %477 = vmax.xlane.f32.xlu1 %v2446_v57  ;;  %461 = vmax.xlane.f32.xlu2 %v2448_v58 }
 0x107   :  { %493 = vmax.xlane.f32.xlu0 %v2450_v59 }
 0x10e   :  { %479 = vmax.xlane.f32.xlu2 %v2457_v61  ;;  %447 = vmax.xlane.f32.xlu1 %v2455_v60 }
 0x10f   :  { %463 = vmax.xlane.f32.xlu0 %v2459_v62 }
 0x116   :  { %495 = vmax.xlane.f32.xlu1 %v2464_v63 }
 0x132   :  { %v434_v0 = vpop.xlane.xlu0 %433 }
 0x133   :  { %v466_v1 = vpop.xlane.xlu1 %465  ;;  %v497_v2 = vsub.f32 %v2371_v32, %v434_v0 }
 0x134   :  { %v513_v3 = vsub.f32 %v2373_v33, %v466_v1 }
 0x135   :  { %v529_v4 = vmul.f32 1.442695, %v497_v2 }
 0x136   :  { %v561_v5 = vmul.f32 1.442695, %v513_v3 }
 0x137   :  { %1906 = vpow2.f32 %v529_v4 }
 0x138   :  { %1908 = vpow2.f32 %v561_v5  ;;  %v450_v6 = vpop.xlane.xlu2 %449 }
 0x139   :  { %v505_v7 = vsub.f32 %v2377_v34, %v450_v6 }
 0x13a   :  { %v482_v8 = vpop.xlane.xlu0 %481 }
 0x13b   :  { %v545_v9 = vmul.f32 1.442695, %v505_v7  ;;  %v521_v10 = vsub.f32 %v2379_v35, %v482_v8 }
 0x13d   :  { %v2471_v11 = vpop.eup %1906  ;;  %1910 = vpow2.f32 %v545_v9  ;;  %v577_v12 = vmul.f32 1.442695, %v521_v10 }
 0x13e   :  { %v2473_v13 = vpop.eup %1908  ;;  %593 = vadd.xlane.f32.xlu2 %v2471_v11 }
 0x13f   :  { %1912 = vpow2.f32 %v577_v12  ;;  %625 = vadd.xlane.f32.xlu0 %v2473_v13 }
 0x140   :  { %v468_v14 = vpop.xlane.xlu2 %467 }
 0x141   :  { %v484_v15 = vpop.xlane.xlu1 %483  ;;  %v514_v16 = vsub.f32 %v2385_v37, %v468_v14 }
 0x142   :  { %v436_v17 = vpop.xlane.xlu0 %435  ;;  %v522_v23 = vsub.f32 %v2389_v39, %v484_v15 }
 0x143   :  { %v2478_v18 = vpop.eup %1910  ;;  %v563_v19 = vmul.f32 1.442695, %v514_v16  ;;  %v498_v20 = vsub.f32 %v2382_v36, %v436_v17 }
 0x144   :  { %609 = vadd.xlane.f32.xlu1 %v2478_v18  ;;  %v579_v26 = vmul.f32 1.442695, %v522_v23 }
 0x145   :  { %v2482_v21 = vpop.eup %1912  ;;  %1914 = vpow2.f32 %v563_v19  ;;  %v531_v22 = vmul.f32 1.442695, %v498_v20 }
 0x146   :  { %641 = vadd.xlane.f32.xlu2 %v2482_v21 }
 0x147   :  { %1916 = vpow2.f32 %v531_v22 }
 0x148   :  { %1918 = vpow2.f32 %v579_v26 }
 0x149   :  { %v486_v24 = vpop.xlane.xlu2 %485  ;;  %v438_v25 = vpop.xlane.xlu1 %437 }
 0x14a   :  { %v499_v27 = vsub.f32 %v2394_v40, %v438_v25  ;;  %v452_v28 = vpop.xlane.xlu0 %451  ;;  %v523_v34 = vsub.f32 %v2398_v42, %v486_v24 }
 0x14b   :  { %v2487_v29 = vpop.eup %1914  ;;  %v506_v30 = vsub.f32 %v2387_v38, %v452_v28 }
 0x14c   :  { %v533_v31 = vmul.f32 1.442695, %v499_v27  ;;  %627 = vadd.xlane.f32.xlu1 %v2487_v29  ;;  %v581_v37 = vmul.f32 1.442695, %v523_v34 }
 0x14d   :  { %v2491_v32 = vpop.eup %1916  ;;  %v547_v33 = vmul.f32 1.442695, %v506_v30 }
 0x14e   :  { %595 = vadd.xlane.f32.xlu0 %v2491_v32  ;;  %1920 = vpow2.f32 %v533_v31  ;;  %v2497_v0 = vpop.eup %1918 }
 0x14f   :  { %1922 = vpow2.f32 %v547_v33 }
 0x150   :  { %1924 = vpow2.f32 %v581_v37 }
 0x151   :  { %v456_v35 = vpop.xlane.xlu2 %455  ;;  %v454_v36 = vpop.xlane.xlu1 %453 }
 0x152   :  { %v507_v39 = vsub.f32 %v2396_v41, %v454_v36  ;;  %v470_v40 = vpop.xlane.xlu0 %469  ;;  %v508_v42 = vsub.f32 %v2407_v45, %v456_v35 }
 0x153   :  { %v515_v38 = vsub.f32 %v2403_v43, %v470_v40 }
 0x154   :  { %v549_v1 = vmul.f32 1.442695, %v507_v39  ;;  %v2499_v2 = vpop.eup %1920  ;;  %v551_v7 = vmul.f32 1.442695, %v508_v42 }
 0x155   :  { %v565_v3 = vmul.f32 1.442695, %v515_v38  ;;  %v2501_v4 = vpop.eup %1922  ;;  %597 = vadd.xlane.f32.xlu1 %v2499_v2 }
 0x156   :  { %643 = vadd.xlane.f32.xlu0 %v2497_v0  ;;  %1926 = vpow2.f32 %v549_v1  ;;  %611 = vadd.xlane.f32.xlu2 %v2501_v4  ;;  %v2508_v8 = vpop.eup %1924 }
 0x157   :  { %1928 = vpow2.f32 %v565_v3 }
 0x158   :  { %1930 = vpow2.f32 %v551_v7 }
 0x159   :  { %v440_v41 = vpop.xlane.xlu1 %439  ;;  %v442_v43 = vpop.xlane.xlu2 %441 }
 0x15a   :  { %v500_v5 = vsub.f32 %v2405_v44, %v440_v41  ;;  %v488_v6 = vpop.xlane.xlu0 %487  ;;  %v501_v25 = vsub.f32 %v2414_v47, %v442_v43 }
 0x15b   :  { %v524_v45 = vsub.f32 %v2416_v48, %v488_v6 }
 0x15c   :  { %v535_v9 = vmul.f32 1.442695, %v500_v5  ;;  %v2510_v10 = vpop.eup %1926  ;;  %v537_v26 = vmul.f32 1.442695, %v501_v25 }
 0x15d   :  { %v2512_v12 = vpop.eup %1928  ;;  %645 = vadd.xlane.f32.xlu1 %v2508_v8  ;;  %v583_v19 = vmul.f32 1.442695, %v524_v45 }
 0x15e   :  { %613 = vadd.xlane.f32.xlu0 %v2510_v10  ;;  %629 = vadd.xlane.f32.xlu2 %v2512_v12  ;;  %1932 = vpow2.f32 %v535_v9  ;;  %v2520_v23 = vpop.eup %1930 }
 0x161   :  { %v472_v44 = vpop.xlane.xlu1 %471  ;;  %v474_v14 = vpop.xlane.xlu2 %473 }
 0x162   :  { %v516_v15 = vsub.f32 %v2412_v46, %v472_v44  ;;  %v517_v16 = vsub.f32 %v2421_v49, %v474_v14  ;;  %v458_v17 = vpop.xlane.xlu0 %457 }
 0x163   :  { %v509_v46 = vsub.f32 %v2423_v50, %v458_v17  ;;  %v1140_v17 = vlaneseq }
 0x164   :  { %v567_v20 = vmul.f32 1.442695, %v516_v15  ;;  %v569_v22 = vmul.f32 1.442695, %v517_v16  ;;  %v2522_v24 = vpop.eup %1932 }
 0x165   :  { %615 = vadd.xlane.f32.xlu1 %v2520_v23  ;;  %v553_v31 = vmul.f32 1.442695, %v509_v46 }
 0x166   :  { %1934 = vpow2.f32 %v567_v20  ;;  %599 = vadd.xlane.f32.xlu2 %v2522_v24 }
 0x167   :  { %1936 = vpow2.f32 %v569_v22 }
 0x168   :  { %1938 = vpow2.f32 %v583_v19 }
 0x169   :  { %v490_v48 = vpop.xlane.xlu1 %489  ;;  %v444_v49 = vpop.xlane.xlu2 %443  ;;  %1940 = vpow2.f32 %v537_v26  ;;  %v2575_v26 = vand.u32 127, %v1140_v17 }
 0x16a   :  { %v502_v27 = vsub.f32 %v2430_v52, %v444_v49  ;;  %v476_v28 = vpop.xlane.xlu0 %475  ;;  %v525_v35 = vsub.f32 %v2428_v51, %v490_v48 }
 0x16b   :  { %v518_v50 = vsub.f32 %v2432_v53, %v476_v28 }
 0x16c   :  { %v2529_v30 = vpop.eup %1934  ;;  %v539_v33 = vmul.f32 1.442695, %v502_v27  ;;  %v585_v37 = vmul.f32 1.442695, %v525_v35 }
 0x16d   :  { %v2531_v47 = vpop.eup %1936  ;;  %631 = vadd.xlane.f32.xlu0 %v2529_v30  ;;  %v571_v38 = vmul.f32 1.442695, %v518_v50 }
 0x16e   :  { %v2534_v34 = vpop.eup %1938  ;;  %633 = vadd.xlane.f32.xlu1 %v2531_v47  ;;  %1942 = vpow2.f32 %v539_v33 }
 0x16f   :  { %647 = vadd.xlane.f32.xlu2 %v2534_v34  ;;  %1944 = vpow2.f32 %v553_v31  ;;  %v2540_v40 = vpop.eup %1940 }
 0x170   :  { %1946 = vpow2.f32 %v585_v37 }
 0x171   :  { %v460_v52 = vpop.xlane.xlu1 %459  ;;  %v492_v36 = vpop.xlane.xlu2 %491  ;;  %1948 = vpow2.f32 %v571_v38 }
 0x172   :  { %v446_v39 = vpop.xlane.xlu0 %445  ;;  %v510_v3 = vsub.f32 %v2437_v54, %v460_v52 }
 0x173   :  { %v503_v53 = vsub.f32 %v2441_v56, %v446_v39 }
 0x174   :  { %v2542_v1 = vpop.eup %1942  ;;  %v555_v43 = vmul.f32 1.442695, %v510_v3 }
 0x175   :  { %601 = vadd.xlane.f32.xlu0 %v2540_v40  ;;  %v2545_v51 = vpop.eup %1944  ;;  %v541_v9 = vmul.f32 1.442695, %v503_v53 }
 0x176   :  { %603 = vadd.xlane.f32.xlu1 %v2542_v1  ;;  %v2552_v7 = vpop.eup %1946  ;;  %1950 = vpow2.f32 %v555_v43 }
 0x177   :  { %617 = vadd.xlane.f32.xlu2 %v2545_v51  ;;  %3299 = vst [vmem:[#allocation7_spill] sm:$0xff] %v2552_v7  ;;  %v2556_v54 = vpop.eup %1948 }
 0x178   :  { %3300 = vst [vmem:[#allocation8_spill] sm:$0xff] %v2556_v54 }
 0x179   :  { %v478_v42 = vpop.xlane.xlu1 %477  ;;  %v462_v41 = vpop.xlane.xlu2 %461 }
 0x17a   :  { %v511_v5 = vsub.f32 %v2448_v58, %v462_v41  ;;  %v494_v6 = vpop.xlane.xlu0 %493  ;;  %v519_v44 = vsub.f32 %v2446_v57, %v478_v42 }
 0x17b   :  { %v527_v49 = vsub.f32 %v2450_v59, %v494_v6 }
 0x17c   :  { %v557_v45 = vmul.f32 1.442695, %v511_v5  ;;  %v573_v56 = vmul.f32 1.442695, %v519_v44  ;;  %v2561_v20 = vpop.eup %1950 }
 0x17d   :  { %649 = vadd.xlane.f32.xlu0 %v2552_v7  ;;  %3301 = vst [vmem:[#allocation9_spill] sm:$0xff] %v2561_v20  ;;  %v589_v50 = vmul.f32 1.442695, %v527_v49 }
 0x17e   :  { %1952 = vpow2.f32 %v557_v45 }
 0x17f   :  { %635 = vadd.xlane.f32.xlu2 %v2556_v54  ;;  %1954 = vpow2.f32 %v541_v9 }
 0x180   :  { %1956 = vpow2.f32 %v573_v56 }
 0x181   :  { %v480_v14 = vpop.xlane.xlu2 %479  ;;  %v448_v15 = vpop.xlane.xlu1 %447 }
 0x182   :  { %v520_v58 = vsub.f32 %v2457_v61, %v480_v14  ;;  %v464_v16 = vpop.xlane.xlu0 %463  ;;  %v504_v48 = vsub.f32 %v2455_v60, %v448_v15  ;;  %v2570_v61 = vshrl.u32 %v1140_v17, 7 }
 0x183   :  { %v512_v19 = vsub.f32 %v2459_v62, %v464_v16  ;;  %v526_v62 = vsub.f32 %v2439_v55, %v492_v36  ;;  %v2587_v55 = vstv %s3283_s0  ;;  %s2060_s0 = smov [#allocation4]  }
 0x184   :  { %v575_v57 = vmul.f32 1.442695, %v520_v58  ;;  %v2563_v22 = vpop.eup %1952  ;;  %v1211_v27 = vmul.u32 128, %v2570_v61  ;;  %v543_v28 = vmul.f32 1.442695, %v504_v48  ;;  %v1195_v37 = vadd.s32 128, %v2570_v61 }
 0x185   :  { %3302 = vst [vmem:[#allocation10_spill] sm:$0xff] %v2563_v22  ;;  %v559_v25 = vmul.f32 1.442695, %v512_v19  ;;  %619 = vadd.xlane.f32.xlu0 %v2561_v20  ;;  %v2566_v46 = vpop.eup %1954  ;;  %621 = vadd.xlane.f32.xlu1 %v2563_v22  ;;  %v587_v33 = vmul.f32 1.442695, %v526_v62  ;;  %v1142_v19 = vadd.s32 8, %v2570_v61 }
 0x186   :  { %3303 = vst [vmem:[#allocation11_spill] sm:$0xff] %v2566_v46  ;;  %1958 = vpow2.f32 %v575_v57  ;;  %v2578_v31 = vpop.eup %1956  ;;  %v1243_v52 = vadd.s32 %v1211_v27, %v2575_v26  ;;  %v1227_v38 = vmul.u32 128, %v1195_v37  ;;  %s1761_s30 = sshll.u32 %s2060_s0, 4  ;;  %s1762_s30 = int_to_ptr.vmem [resolvable:$true] %s1761_s30 }
 0x187   :  { %605 = vadd.xlane.f32.xlu2 %v2566_v46  ;;  %1960 = vpow2.f32 %v559_v25  ;;  %3304 = vst [vmem:[#allocation12_spill] sm:$0xff] %v2578_v31  ;;  %v1196_v49 = vadd.s32 128, %v1142_v19 }
 0x188   :  { %1962 = vpow2.f32 %v543_v28  ;;  %v1277_v39 = vadd.s32 %v2587_v55, %v1243_v52  ;;  %v1259_v53 = vadd.s32 %v1227_v38, %v2575_v26  ;;  %v1212_v38 = vmul.u32 128, %v1142_v19 }
 0x189   :  { %v496_v60 = vpop.xlane.xlu1 %495  ;;  %1964 = vpow2.f32 %v587_v33  ;;  %v1150_v19 = vadd.s32 72, %v2570_v61 }
 0x18a   :  { %v528_v36 = vsub.f32 %v2464_v63, %v496_v60  ;;  %1966 = vpow2.f32 %v589_v50  ;;  %v1309_v41 = vshrl.u32 %v1277_v39, 16  ;;  %v1293_v43 = vadd.s32 %v2587_v55, %v1259_v53 }
 0x18b   :  { %v1149_v63 = vadd.s32 64, %v2570_v61  ;;  %v1228_v60 = vmul.u32 128, %v1196_v49 }
 0x18c   :  { %v2580_v35 = vpop.eup %1958  ;;  %v591_v3 = vmul.f32 1.442695, %v528_v36  ;;  %v1325_v9 = vshrl.u32 %v1293_v43, 16  ;;  %v1341_v56 = vxor.u32 %v1309_v41, %v1277_v39 }
 0x18d   :  { %3305 = vst [vmem:[#allocation13_spill] sm:$0xff] %v2580_v35  ;;  %637 = vadd.xlane.f32.xlu0 %v2578_v31  ;;  %v2589_v59 = vpop.eup %1960  ;;  %639 = vadd.xlane.f32.xlu1 %v2580_v35  ;;  %v1219_v45 = vmul.u32 128, %v1149_v63  ;;  %v1203_v44 = vadd.s32 128, %v1149_v63  ;;  %v1260_v37 = vadd.s32 %v1228_v60, %v2575_v26 }
 0x18e   :  { %3306 = vst [vmem:[#allocation14_spill] sm:$0xff] %v2589_v59  ;;  %v2597_v42 = vpop.eup %1962  ;;  %1968 = vpow2.f32 %v591_v3  ;;  %v1357_v58 = vxor.u32 %v1325_v9, %v1293_v43  ;;  %v1373_v25 = vmul.u32 2146121005, %v1341_v56  ;;  %v1244_v43 = vadd.s32 %v1212_v38, %v2575_v26 }
 0x18f   :  { %623 = vadd.xlane.f32.xlu2 %v2589_v59  ;;  %3307 = vst [vmem:[#allocation15_spill] sm:$0xff] %v2597_v42  ;;  %v2601_v5 = vpop.eup %1964  ;;  %v1251_v14 = vadd.s32 %v1219_v45, %v2575_v26  ;;  %v1235_v15 = vmul.u32 128, %v1203_v44  ;;  %v1294_v41 = vadd.s32 %v2587_v55, %v1260_v37  ;;  %v1220_v37 = vmul.u32 128, %v1150_v19 }
 0x190   :  { %3308 = vst [vmem:[#allocation16_spill] sm:$0xff] %v2601_v5  ;;  %v2604_v6 = vpop.eup %1966  ;;  %v1389_v27 = vmul.u32 2146121005, %v1357_v58  ;;  %v1405_v50 = vshrl.u32 %v1373_v25, 15  ;;  %v1278_v56 = vadd.s32 %v2587_v55, %v1244_v43 }
 0x191   :  { %3309 = vst [vmem:[#allocation17_spill] sm:$0xff] %v2604_v6  ;;  %v1285_v16 = vadd.s32 %v2587_v55, %v1251_v14  ;;  %v1267_v17 = vadd.s32 %v1235_v15, %v2575_v26  ;;  %v1326_v45 = vshrl.u32 %v1294_v41, 16 }
 0x192   :  { %v1421_v39 = vshrl.u32 %v1389_v27, 15  ;;  %v1437_v63 = vxor.u32 %v1405_v50, %v1373_v25 }
 0x193   :  { %v1317_v48 = vshrl.u32 %v1285_v16, 16  ;;  %v1301_v62 = vadd.s32 %v2587_v55, %v1267_v17  ;;  %v1358_v58 = vxor.u32 %v1326_v45, %v1294_v41  ;;  %v2621_v17 = vadd.s32 16, %v2570_v61 }
 0x194   :  { %v2612_v57 = vpop.eup %1968  ;;  %v1453_v44 = vxor.u32 %v1421_v39, %v1389_v27  ;;  %v1204_v27 = vadd.s32 128, %v1150_v19  ;;  %v1252_v41 = vadd.s32 %v1220_v37, %v2575_v26 }
 0x195   :  { %607 = vadd.xlane.f32.xlu0 %v2597_v42  ;;  %651 = vadd.xlane.f32.xlu1 %v2601_v5  ;;  %3310 = vst [vmem:[#allocation18_spill] sm:$0xff] %v2612_v57  ;;  %v1349_v28 = vxor.u32 %v1317_v48, %v1285_v16  ;;  %v1333_v33 = vshrl.u32 %v1301_v62, 16  ;;  %v1310_v16 = vshrl.u32 %v1278_v56, 16  ;;  %v1469_v48 = vmul.u32 2221713035, %v1437_v63 }
 0x196   :  { %v1390_v49 = vmul.u32 2146121005, %v1358_v58  ;;  %v1213_v25 = vmul.u32 128, %v2621_v17 }
 0x197   :  { %653 = vadd.xlane.f32.xlu2 %v2604_v6  ;;  %v1381_v52 = vmul.u32 2146121005, %v1349_v28  ;;  %v1365_v36 = vxor.u32 %v1333_v33, %v1301_v62  ;;  %v1485_v62 = vmul.u32 2221713035, %v1453_v44  ;;  %v1342_v28 = vxor.u32 %v1310_v16, %v1278_v56 }
 0x198   :  { %v1422_v50 = vshrl.u32 %v1390_v49, 15  ;;  %v1501_v39 = vshrl.u32 %v1469_v48, 16 }
 0x199   :  { %v1413_v3 = vshrl.u32 %v1381_v52, 15  ;;  %v1397_v53 = vmul.u32 2146121005, %v1365_v36  ;;  %v1374_v36 = vmul.u32 2146121005, %v1342_v28  ;;  %v1517_v43 = vshrl.u32 %v1485_v62, 16 }
 0x19a   :  { %v1454_v38 = vxor.u32 %v1422_v50, %v1390_v49  ;;  %v1533_v58 = vxor.u32 %v1501_v39, %v1469_v48 }
 0x19b   :  { %v1429_v9 = vshrl.u32 %v1397_v53, 15  ;;  %v1445_v14 = vxor.u32 %v1413_v3, %v1381_v52  ;;  %v1245_v52 = vadd.s32 %v1213_v25, %v2575_v26  ;;  %v1406_v3 = vshrl.u32 %v1374_v36, 15 }
 0x19c   :  { %v1486_v45 = vmul.u32 2221713035, %v1454_v38  ;;  %v1549_v49 = vxor.u32 %v1517_v43, %v1485_v62  ;;  %v1839_v48 = vxor.u32 2147483648, %v1533_v58 }
 0x19d   :  { %655 = vadd.xlane.f32.xlu0 %v2612_v57  ;;  %v1461_v15 = vxor.u32 %v1429_v9, %v1397_v53  ;;  %v1477_v33 = vmul.u32 2221713035, %v1445_v14  ;;  %v1279_v53 = vadd.s32 %v2587_v55, %v1245_v52  ;;  %v1438_v44 = vxor.u32 %v1406_v3, %v1374_v36 }
 0x19e   :  { %v1236_v14 = vmul.u32 128, %v1204_v27  ;;  %v1518_v25 = vshrl.u32 %v1486_v45, 16  ;;  %vm2674_vm5 = vcmp.ge.s32.totalorder %v1839_v48, 2576980378 }
 0x19f   :  { %v1493_v60 = vmul.u32 2221713035, %v1461_v15  ;;  %v1509_v63 = vshrl.u32 %v1477_v33, 16  ;;  %v1311_v56 = vshrl.u32 %v1279_v53, 16  ;;  %v1286_v15 = vadd.s32 %v2587_v55, %v1252_v41 }
 0x1a0   :  { %v1470_v50 = vmul.u32 2221713035, %v1438_v44  ;;  %v1268_v27 = vadd.s32 %v1236_v14, %v2575_v26  ;;  %v2644_v41 = vxor.u32 %v1518_v25, %v1486_v45 }
 0x1a1   :  { %v1525_v9 = vshrl.u32 %v1493_v60, 16  ;;  %v1343_v19 = vxor.u32 %v1311_v56, %v1279_v53  ;;  %v2635_v52 = vxor.u32 %v1509_v63, %v1477_v33  ;;  %v1318_v37 = vshrl.u32 %v1286_v15, 16 }
 0x1a2   :  { %v1502_v43 = vshrl.u32 %v1470_v50, 16  ;;  %v1855_v33 = vxor.u32 2147483648, %v1549_v49  ;;  %v1302_v44 = vadd.s32 %v2587_v55, %v1268_v27 }
 0x1a3   :  { %v2637_v36 = vxor.u32 %v1525_v9, %v1493_v60  ;;  %v1375_v3 = vmul.u32 2146121005, %v1343_v19  ;;  %v1847_v60 = vxor.u32 2147483648, %v2635_v52  ;;  %v2654_v14 = vxor.u32 %v1318_v37, %v1286_v15 }
 0x1a4   :  { %v2669_v37 = vxor.u32 %v1502_v43, %v1470_v50  ;;  %v1334_v59 = vshrl.u32 %v1302_v44, 16  ;;  %vm2682_vm7 = vcmp.ge.s32.totalorder %v1855_v33, 2576980378 }
 0x1a5   :  { %v1407_v52 = vshrl.u32 %v1375_v3, 15  ;;  %v1382_v42 = vmul.u32 2146121005, %v2654_v14  ;;  %vm2714_vm14 = vcmp.ge.s32.totalorder %v1847_v60, 2576980378 }
 0x1b1   :  { %v2629_v16 = vpop.xlane.xlu2 %593 }
 0x1b2   :  { %1970 = vrcp.f32 %v2629_v16  ;;  %v2632_v28 = vpop.xlane.xlu0 %625  ;;  %v666_v39 = vand.u32 2147483647, %v2629_v16  ;;  %v668_v38 = vand.u32 2147483648, %v2629_v16  ;;  %vm662_vm1 = vweird.f32 %v2629_v16 }
 0x1b3   :  { %1972 = vrcp.f32 %v2632_v28  ;;  %v906_v62 = vand.u32 2147483647, %v2632_v28  ;;  %v908_v53 = vand.u32 2147483648, %v2632_v28  ;;  %vm902_vm2 = vweird.f32 %v2632_v28 }
 0x1b4   :  { %vm2657_vm3 = vcmp.eq.f32.partialorder %v666_v39, 8.507059e+37  ;;  %v669_v49 = vor.u32 1.1754944e-38, %v668_v38 }
 0x1b5   :  { %vm2664_vm4 = vcmp.eq.f32.partialorder %v906_v62, 8.507059e+37  ;;  %v909_v57 = vor.u32 1.1754944e-38, %v908_v53  ;;  %v2680_v53 = vadd.s32 80, %v2570_v61 }
 0x1b7   :  { %v2647_v63 = vpop.xlane.xlu1 %609 }
 0x1b8   :  { %v1971_v56 = vpop.eup %1970  ;;  %1974 = vrcp.f32 %v2647_v63  ;;  %v786_v39 = vand.u32 2147483647, %v2647_v63  ;;  %v788_v5 = vand.u32 2147483648, %v2647_v63  ;;  %vm782_vm8 = vweird.f32 %v2647_v63 }
 0x1b9   :  { %v1973_v45 = vpop.eup %1972  ;;  %v658_v58 = vmul.f32 %v1971_v56, %v2629_v16  ;;  %v2661_v25 = vpop.xlane.xlu2 %641  ;;  %vm663_vm6 = vweird.f32 %v1971_v56 }
 0x1ba   :  { %v898_v27 = vmul.f32 %v1973_v45, %v2632_v28  ;;  %1976 = vrcp.f32 %v2661_v25  ;;  %v1028_v48 = vand.u32 2147483648, %v2661_v25  ;;  %vm903_vm9 = vweird.f32 %v1973_v45  ;;  %vm664_vm11 = vmor %vm662_vm1, %vm663_vm6 }
 0x1bb   :  { %v659_v6 = vsub.f32 1.0, %v658_v58  ;;  %v2688_v58 = vxor.u32 %v1407_v52, %v1375_v3  ;;  %v1026_v14 = vand.u32 2147483647, %v2661_v25  ;;  %vm2693_vm10 = vcmp.eq.f32.partialorder %v786_v39, 8.507059e+37  ;;  %vm904_vm13 = vmor %vm902_vm2, %vm903_vm9 }
 0x1bc   :  { %v899_v62 = vsub.f32 1.0, %v898_v27  ;;  %v789_v46 = vor.u32 1.1754944e-38, %v788_v5  ;;  %vm1022_vm12 = vweird.f32 %v2661_v25  ;;  %v1414_v52 = vshrl.u32 %v1382_v42, 15 }
 0x1bd   :  { %v660_v50 = vmul.f32 %v1971_v56, %v659_v6  ;;  %v1029_v35 = vor.u32 1.1754944e-38, %v1028_v48  ;;  %v1471_v16 = vmul.u32 2221713035, %v2688_v58  ;;  %vm2719_vm15 = vcmp.eq.f32.partialorder %v1026_v14, 8.507059e+37 }
 0x1be   :  { %v1975_v15 = vpop.eup %1974  ;;  %v900_v27 = vmul.f32 %v1973_v45, %v899_v62  ;;  %v2704_v62 = vxor.u32 %v1334_v59, %v1302_v44  ;;  %v2724_v28 = vadd.s32 128, %v2680_v53  ;;  %v3325_v14 = vxor.u32 2147483648, %v2637_v36 }
 0x1bf   :  { %v661_v31 = vadd.f32 %v1971_v56, %v660_v50  ;;  %v778_v6 = vmul.f32 %v1975_v15, %v2647_v63  ;;  %v2697_v22 = vpop.xlane.xlu1 %627  ;;  %vm783_vm0 = vweird.f32 %v1975_v15 }
 0x1c0   :  { %v901_v3 = vadd.f32 %v1973_v45, %v900_v27  ;;  %1978 = vrcp.f32 %v2697_v22  ;;  %v1977_v50 = vpop.eup %1976  ;;  %vm2734_vm1 = vcmp.ge.s32.totalorder %v3325_v14, 2576980378  ;;  %vm917_vm2 = vweird.f32 %v2697_v22 }
 0x1c1   :  { %v665_v39 = vsel %vm664_vm11, %v1971_v56, %v661_v31  ;;  %v779_v5 = vsub.f32 1.0, %v778_v6  ;;  %v2709_v20 = vpop.xlane.xlu0 %595  ;;  %v1018_v31 = vmul.f32 %v1977_v50, %v2661_v25  ;;  %v1398_v38 = vmul.u32 2146121005, %v2704_v62 }
 0x1c2   :  { %v670_v27 = vsel %vm2657_vm3, %v669_v49, %v665_v39  ;;  %v905_v54 = vsel %vm904_vm13, %v1973_v45, %v901_v3  ;;  %1980 = vrcp.f32 %v2709_v20  ;;  %v2729_v49 = vxor.u32 %v1414_v52, %v1382_v42  ;;  %vm784_vm3 = vmor %vm782_vm8, %vm783_vm0 }
 0x1c3   :  { %v671_v44 = vmul.f32 1.1111112, %v670_v27  ;;  %v910_v56 = vsel %vm2664_vm4, %v909_v57, %v905_v54  ;;  %v780_v19 = vmul.f32 %v1975_v15, %v779_v5  ;;  %v1019_v60 = vsub.f32 1.0, %v1018_v31 }
 0x1c4   :  { %v911_v45 = vmul.f32 1.1111112, %v910_v56  ;;  %v921_v54 = vand.u32 2147483647, %v2697_v22  ;;  %v923_v57 = vand.u32 2147483648, %v2697_v22  ;;  %vm1023_vm4 = vweird.f32 %v1977_v50 }
 0x1c5   :  { %v1661_v48 = vmul.f32 %v2471_v11, %v671_v44  ;;  %v781_v58 = vadd.f32 %v1975_v15, %v780_v19  ;;  %v1020_v11 = vmul.f32 %v1977_v50, %v1019_v60  ;;  %v1503_v42 = vshrl.u32 %v1471_v16, 16 }
 0x1c6   :  { %v1979_v9 = vpop.eup %1978  ;;  %v1677_v3 = vmul.f32 %v2473_v13, %v911_v45  ;;  %v681_v5 = vand.u32 2147483647, %v2709_v20  ;;  %v683_v31 = vand.u32 2147483648, %v2709_v20  ;;  %vm2755_vm6 = vcmp.eq.f32.partialorder %v921_v54, 8.507059e+37 }
 0x1c7   :  { %v1693_v36 = vsel %vm2674_vm5, %v1661_v48, 0.0  ;;  %v785_v52 = vsel %vm784_vm3, %v1975_v15, %v781_v58  ;;  %v913_v39 = vmul.f32 %v1979_v9, %v2697_v22  ;;  %v1021_v63 = vadd.f32 %v1977_v50, %v1020_v11  ;;  %vm1024_vm5 = vmor %vm1022_vm12, %vm1023_vm4 }
 0x1c8   :  { %1725 = vst [vmem:[#allocation4] sm:$0xff] %v1693_v36  ;;  %v1709_v27 = vsel %vm2682_vm7, %v1677_v3, 0.0  ;;  %v790_v13 = vsel %vm2693_vm10, %v789_v46, %v785_v52  ;;  %v924_v56 = vor.u32 1.1754944e-38, %v923_v57  ;;  %v2759_v19 = vpop.xlane.xlu1 %597  ;;  %v1981_v43 = vpop.eup %1980  ;;  %v3330_v46 = vxor.u32 2147483648, %v2644_v41 }
 0x1c9   :  { %1741 = vst [vmem:[#allocation4 + $0x80] sm:$0xff] %v1709_v27  ;;  %v791_v44 = vmul.f32 1.1111112, %v790_v13  ;;  %v914_v15 = vsub.f32 1.0, %v913_v39  ;;  %v1025_v45 = vsel %vm1024_vm5, %v1977_v50, %v1021_v63  ;;  %vm918_vm8 = vweird.f32 %v1979_v9  ;;  %v2772_v54 = vpop.xlane.xlu2 %611  ;;  %v2800_v13 = vpop.xlane.xlu0 %643 }
 0x1ca   :  { %vm2763_vm7 = vcmp.ge.s32.totalorder %v3330_v46, 2576980378  ;;  %v1535_v60 = vxor.u32 %v1503_v42, %v1471_v16  ;;  %1982 = vrcp.f32 %v2759_v19  ;;  %v1030_v48 = vsel %vm2719_vm15, %v1029_v35, %v1025_v45  ;;  %vm919_vm11 = vmor %vm917_vm2, %vm918_vm8 }
 0x1cb   :  { %v1669_v25 = vmul.f32 %v2478_v18, %v791_v44  ;;  %v915_v58 = vmul.f32 %v1979_v9, %v914_v15  ;;  %v673_v14 = vmul.f32 %v1981_v43, %v2709_v20  ;;  %v1031_v50 = vmul.f32 1.1111112, %v1030_v48 }
 0x1cc   :  { %vm677_vm9 = vweird.f32 %v2709_v20  ;;  %vm2775_vm10 = vcmp.eq.f32.partialorder %v681_v5, 8.507059e+37  ;;  %v684_v16 = vor.u32 1.1754944e-38, %v683_v31  ;;  %v696_v35 = vand.u32 2147483647, %v2759_v19 }
 0x1cd   :  { %v1701_v57 = vsel %vm2714_vm14, %v1669_v25, 0.0  ;;  %v916_v18 = vadd.f32 %v1979_v9, %v915_v58  ;;  %v674_v3 = vsub.f32 1.0, %v673_v14  ;;  %v1685_v59 = vmul.f32 %v2482_v21, %v1031_v50 }
 0x1ce   :  { %1733 = vst [vmem:[#allocation4 + $0x40] sm:$0xff] %v1701_v57  ;;  %v3335_v11 = vxor.u32 2147483648, %v2669_v37  ;;  %v1841_v36 = vxor.u32 2147483648, %v1535_v60  ;;  %v1478_v7 = vmul.u32 2221713035, %v2729_v49  ;;  %1984 = vrcp.f32 %v2772_v54 }
 0x1cf   :  { %v920_v52 = vsel %vm919_vm11, %v1979_v9, %v916_v18  ;;  %v675_v39 = vmul.f32 %v1981_v43, %v674_v3  ;;  %vm678_vm13 = vweird.f32 %v1981_v43  ;;  %vm692_vm14 = vweird.f32 %v2759_v19 }
 0x1d0   :  { %vm2788_vm12 = vcmp.ge.s32.totalorder %v3335_v11, 2576980378  ;;  %v1983_v21 = vpop.eup %1982  ;;  %v1717_v22 = vsel %vm2734_vm1, %v1685_v59, 0.0  ;;  %v925_v37 = vsel %vm2755_vm6, %v924_v56, %v920_v52  ;;  %v698_v5 = vand.u32 2147483648, %v2759_v19  ;;  %vm679_vm0 = vmor %vm677_vm9, %vm678_vm13  ;;  %v2824_v50 = vpop.xlane.xlu1 %645 }
 0x1d1   :  { %v1510_v27 = vshrl.u32 %v1478_v7, 16  ;;  %1749 = vst [vmem:[#allocation4 + $0xc0] sm:$0xff] %v1717_v22  ;;  %v926_v49 = vmul.f32 1.1111112, %v925_v37  ;;  %v676_v63 = vadd.f32 %v1981_v43, %v675_v39  ;;  %v688_v9 = vmul.f32 %v1983_v21, %v2759_v19 }
 0x1d2   :  { %vm2803_vm15 = vcmp.eq.f32.partialorder %v696_v35, 8.507059e+37  ;;  %v801_v44 = vand.u32 2147483647, %v2772_v54  ;;  %v803_v15 = vand.u32 2147483648, %v2772_v54  ;;  %vm797_vm1 = vweird.f32 %v2772_v54 }
 0x1d3   :  { %v1542_v6 = vxor.u32 %v1510_v27, %v1478_v7  ;;  %v1678_v56 = vmul.f32 %v2487_v29, %v926_v49  ;;  %v680_v45 = vsel %vm679_vm0, %v1981_v43, %v676_v63  ;;  %v689_v46 = vsub.f32 1.0, %v688_v9 }
 0x1d4   :  { %1986 = vrcp.f32 %v2800_v13  ;;  %v1985_v60 = vpop.eup %1984  ;;  %v685_v20 = vsel %vm2775_vm10, %v684_v16, %v680_v45  ;;  %vm2817_vm2 = vcmp.ge.s32.totalorder %v1841_v36, 2576980378  ;;  %vm693_vm3 = vweird.f32 %v1983_v21 }
 0x1d5   :  { %v699_v48 = vor.u32 1.1754944e-38, %v698_v5  ;;  %v1430_v58 = vshrl.u32 %v1398_v38, 15  ;;  %v1710_v29 = vsel %vm2763_vm7, %v1678_v56, 0.0  ;;  %v686_v62 = vmul.f32 1.1111112, %v685_v20  ;;  %vm694_vm5 = vmor %vm692_vm14, %vm693_vm3 }
 0x1d6   :  { %v690_v43 = vmul.f32 %v1983_v21, %v689_v46  ;;  %v793_v14 = vmul.f32 %v1985_v60, %v2772_v54  ;;  %1742 = vst [vmem:[#allocation4 + $0x88] sm:$0xff] %v1710_v29  ;;  %v1848_v57 = vxor.u32 2147483648, %v1542_v6  ;;  %vm2826_vm4 = vcmp.eq.f32.partialorder %v801_v44, 8.507059e+37 }
 0x1d7   :  { %v804_v16 = vor.u32 1.1754944e-38, %v803_v15  ;;  %v1462_v18 = vxor.u32 %v1430_v58, %v1398_v38  ;;  %v1662_v3 = vmul.f32 %v2491_v32, %v686_v62  ;;  %v1041_v33 = vand.u32 2147483647, %v2800_v13 }
 0x1d8   :  { %v691_v35 = vadd.f32 %v1983_v21, %v690_v43  ;;  %v794_v59 = vsub.f32 1.0, %v793_v14  ;;  %v1043_v36 = vand.u32 2147483648, %v2800_v13  ;;  %v1237_v7 = vmul.u32 128, %v2724_v28 }
 0x1d9   :  { %v1494_v11 = vmul.u32 2221713035, %v1462_v18  ;;  %1988 = vrcp.f32 %v2824_v50  ;;  %v1694_v39 = vsel %vm2788_vm12, %v1662_v3, 0.0  ;;  %vm798_vm6 = vweird.f32 %v1985_v60  ;;  %v2876_v18 = vpop.xlane.xlu0 %613 }
 0x1da   :  { %v1987_v52 = vpop.eup %1986  ;;  %v695_v32 = vsel %vm694_vm5, %v1983_v21, %v691_v35  ;;  %v795_v22 = vmul.f32 %v1985_v60, %v794_v59  ;;  %1726 = vst [vmem:[#allocation4 + $0x8] sm:$0xff] %v1694_v39  ;;  %vm1037_vm7 = vweird.f32 %v2800_v13  ;;  %vm2844_vm8 = vcmp.ge.s32.totalorder %v1848_v57, 2576980378  ;;  %vm799_vm9 = vmor %vm797_vm1, %vm798_vm6 }
 0x1db   :  { %v700_v37 = vsel %vm2803_vm15, %v699_v48, %v695_v32  ;;  %v1526_v19 = vshrl.u32 %v1494_v11, 16  ;;  %v1033_v5 = vmul.f32 %v1987_v52, %v2800_v13  ;;  %v1269_v42 = vadd.s32 %v1237_v7, %v2575_v26 }
 0x1dc   :  { %v701_v27 = vmul.f32 1.1111112, %v700_v37  ;;  %v796_v49 = vadd.f32 %v1985_v60, %v795_v22  ;;  %vm2851_vm10 = vcmp.eq.f32.partialorder %v1041_v33, 8.507059e+37  ;;  %v1044_v31 = vor.u32 1.1754944e-38, %v1043_v36 }
 0x1dd   :  { %v1558_v21 = vxor.u32 %v1526_v19, %v1494_v11  ;;  %v1034_v63 = vsub.f32 1.0, %v1033_v5  ;;  %v1303_v15 = vadd.s32 %v2587_v55, %v1269_v42  ;;  %v1197_v38 = vadd.s32 128, %v2621_v17 }
 0x1de   :  { %v1663_v6 = vmul.f32 %v2499_v2, %v701_v27  ;;  %v800_v44 = vsel %vm799_vm9, %v1985_v60, %v796_v49  ;;  %vm1038_vm11 = vweird.f32 %v1987_v52  ;;  %v2863_v2 = vpop.xlane.xlu2 %629  ;;  %vm1052_vm12 = vweird.f32 %v2824_v50 }
 0x1df   :  { %v1989_v56 = vpop.eup %1988  ;;  %v805_v45 = vsel %vm2826_vm4, %v804_v16, %v800_v44  ;;  %v1864_v54 = vxor.u32 2147483648, %v1558_v21  ;;  %v1035_v46 = vmul.f32 %v1987_v52, %v1034_v63  ;;  %v1335_v58 = vshrl.u32 %v1303_v15, 16  ;;  %vm1039_vm13 = vmor %vm1037_vm7, %vm1038_vm11 }
 0x1e0   :  { %v1695_v20 = vsel %vm2817_vm2, %v1663_v6, 0.0  ;;  %v806_v48 = vmul.f32 1.1111112, %v805_v45  ;;  %v1048_v29 = vmul.f32 %v1989_v56, %v2824_v50  ;;  %v1056_v17 = vand.u32 2147483647, %v2824_v50 }
 0x1e1   :  { %1727 = vst [vmem:[#allocation4 + $0x10] sm:$0xff] %v1695_v20  ;;  %v1036_v60 = vadd.f32 %v1987_v52, %v1035_v46  ;;  %v1058_v62 = vand.u32 2147483648, %v2824_v50  ;;  %v1367_v25 = vxor.u32 %v1335_v58, %v1303_v15  ;;  %v1229_v57 = vmul.u32 128, %v1197_v38  ;;  %v2903_v15 = vpop.xlane.xlu1 %615 }
 0x1e2   :  { %v1670_v43 = vmul.f32 %v2501_v4, %v806_v48  ;;  %v1049_v14 = vsub.f32 1.0, %v1048_v29  ;;  %vm2871_vm14 = vcmp.ge.s32.totalorder %v1864_v54, 2576980378  ;;  %vm1053_vm15 = vweird.f32 %v1989_v56 }
 0x1e3   :  { %v1040_v16 = vsel %vm1039_vm13, %v1987_v52, %v1036_v60  ;;  %1990 = vrcp.f32 %v2863_v2  ;;  %v1399_v13 = vmul.u32 2146121005, %v1367_v25  ;;  %v1261_v33 = vadd.s32 %v1229_v57, %v2575_v26  ;;  %vm1054_vm0 = vmor %vm1052_vm12, %vm1053_vm15 }
 0x1e4   :  { %v1702_v3 = vsel %vm2844_vm8, %v1670_v43, 0.0  ;;  %v1045_v4 = vsel %vm2851_vm10, %v1044_v31, %v1040_v16  ;;  %v1050_v35 = vmul.f32 %v1989_v56, %v1049_v14  ;;  %v936_v11 = vand.u32 2147483647, %v2863_v2 }
 0x1e5   :  { %1734 = vst [vmem:[#allocation4 + $0x48] sm:$0xff] %v1702_v3  ;;  %v1046_v59 = vmul.f32 1.1111112, %v1045_v4  ;;  %v938_v36 = vand.u32 2147483648, %v2863_v2  ;;  %v1431_v7 = vshrl.u32 %v1399_v13, 15  ;;  %v1221_v39 = vmul.u32 128, %v2680_v53 }
 0x1e6   :  { %v1051_v52 = vadd.f32 %v1989_v56, %v1050_v35  ;;  %1992 = vrcp.f32 %v2876_v18  ;;  %v1059_v22 = vor.u32 1.1754944e-38, %v1058_v62  ;;  %v1295_v37 = vadd.s32 %v2587_v55, %v1261_v33 }
 0x1e7   :  { %v1686_v32 = vmul.f32 %v2497_v0, %v1046_v59  ;;  %v1463_v19 = vxor.u32 %v1431_v7, %v1399_v13  ;;  %vm1057_vm1 = vcmp.eq.f32.partialorder %v1056_v17, 8.507059e+37  ;;  %v1253_v27 = vadd.s32 %v1221_v39, %v2575_v26 }
 0x1e8   :  { %v1055_v5 = vsel %vm1054_vm0, %v1989_v56, %v1051_v52  ;;  %v1327_v42 = vshrl.u32 %v1295_v37, 16  ;;  %vm932_vm2 = vweird.f32 %v2863_v2  ;;  %vm2897_vm3 = vcmp.eq.f32.partialorder %v936_v11, 8.507059e+37 }
 0x1e9   :  { %v1991_v28 = vpop.eup %1990  ;;  %v1718_v53 = vsel %vm2871_vm14, %v1686_v32, 0.0  ;;  %v1060_v49 = vsel %vm1057_vm1, %v1059_v22, %v1055_v5  ;;  %v1495_v0 = vmul.u32 2221713035, %v1463_v19  ;;  %v939_v63 = vor.u32 1.1754944e-38, %v938_v36 }
 0x1ea   :  { %1750 = vst [vmem:[#allocation4 + $0xc8] sm:$0xff] %v1718_v53  ;;  %v928_v50 = vmul.f32 %v1991_v28, %v2863_v2  ;;  %v1061_v9 = vmul.f32 1.1111112, %v1060_v49  ;;  %v1359_v31 = vxor.u32 %v1327_v42, %v1295_v37  ;;  %v1287_v6 = vadd.s32 %v2587_v55, %v1253_v27  ;;  %v2932_v53 = vpop.xlane.xlu2 %599 }
 0x1eb   :  { %v816_v44 = vand.u32 2147483647, %v2876_v18  ;;  %v1527_v56 = vshrl.u32 %v1495_v0, 16  ;;  %vm812_vm4 = vweird.f32 %v2876_v18  ;;  %v818_v54 = vand.u32 2147483648, %v2876_v18 }
 0x1ec   :  { %v1993_v38 = vpop.eup %1992  ;;  %v929_v45 = vsub.f32 1.0, %v928_v50  ;;  %v2908_v46 = vadd.s32 88, %v2570_v61  ;;  %v1391_v20 = vmul.u32 2146121005, %v1359_v31  ;;  %vm933_vm5 = vweird.f32 %v1991_v28 }
 0x1ed   :  { %v1319_v48 = vshrl.u32 %v1287_v6, 16  ;;  %v808_v58 = vmul.f32 %v1993_v38, %v2876_v18  ;;  %v1559_v29 = vxor.u32 %v1527_v56, %v1495_v0  ;;  %1994 = vrcp.f32 %v2903_v15  ;;  %vm934_vm7 = vmor %vm932_vm2, %vm933_vm5 }
 0x1ee   :  { %v930_v60 = vmul.f32 %v1991_v28, %v929_v45  ;;  %v1222_v17 = vmul.u32 128, %v2908_v46  ;;  %v1687_v62 = vmul.f32 %v2508_v8, %v1061_v9  ;;  %v1423_v43 = vshrl.u32 %v1391_v20, 15 }
 0x1ef   :  { %v1351_v25 = vxor.u32 %v1319_v48, %v1287_v6  ;;  %v809_v14 = vsub.f32 1.0, %v808_v58  ;;  %v1865_v57 = vxor.u32 2147483648, %v1559_v29  ;;  %vm2914_vm6 = vcmp.eq.f32.partialorder %v816_v44, 8.507059e+37 }
 0x1f0   :  { %v931_v41 = vadd.f32 %v1991_v28, %v930_v60  ;;  %v1254_v3 = vadd.s32 %v1222_v17, %v2575_v26  ;;  %v1455_v4 = vxor.u32 %v1423_v43, %v1391_v20  ;;  %v819_v59 = vor.u32 1.1754944e-38, %v818_v54  ;;  %v2945_v17 = vpop.xlane.xlu0 %631 }
 0x1f1   :  { %v1383_v13 = vmul.u32 2146121005, %v1351_v25  ;;  %v810_v35 = vmul.f32 %v1993_v38, %v809_v14  ;;  %vm1645_vm8 = vcmp.ge.s32.totalorder %v1865_v57, 2576980378  ;;  %vm813_vm9 = vweird.f32 %v1993_v38 }
 0x1f2   :  { %v935_v8 = vsel %vm934_vm7, %v1991_v28, %v931_v41  ;;  %v1288_v33 = vadd.s32 %v2587_v55, %v1254_v3  ;;  %v1719_v11 = vsel %vm1645_vm8, %v1687_v62, 0.0  ;;  %v1487_v36 = vmul.u32 2221713035, %v1455_v4  ;;  %vm814_vm11 = vmor %vm812_vm4, %vm813_vm9 }
 0x1f3   :  { %v940_v7 = vsel %vm2897_vm3, %v939_v63, %v935_v8  ;;  %v1415_v52 = vshrl.u32 %v1383_v13, 15  ;;  %vm827_vm10 = vweird.f32 %v2903_v15  ;;  %v1995_v39 = vpop.eup %1994  ;;  %1751 = vst [vmem:[#allocation4 + $0xd0] sm:$0xff] %v1719_v11  ;;  %v811_v32 = vadd.f32 %v1993_v38, %v810_v35 }
 0x1f4   :  { %v941_v2 = vmul.f32 1.1111112, %v940_v7  ;;  %v1320_v22 = vshrl.u32 %v1288_v33, 16  ;;  %v831_v37 = vand.u32 2147483647, %v2903_v15  ;;  %v1519_v19 = vshrl.u32 %v1487_v36, 16  ;;  %v2957_v7 = vpop.xlane.xlu1 %633 }
 0x1f5   :  { %v1447_v5 = vxor.u32 %v1415_v52, %v1383_v13  ;;  %v823_v27 = vmul.f32 %v1995_v39, %v2903_v15  ;;  %v833_v28 = vand.u32 2147483648, %v2903_v15  ;;  %v815_v42 = vsel %vm814_vm11, %v1993_v38, %v811_v32 }
 0x1f6   :  { %v1679_v49 = vmul.f32 %v2512_v12, %v941_v2  ;;  %v1352_v0 = vxor.u32 %v1320_v22, %v1288_v33  ;;  %v1144_v50 = vadd.s32 24, %v2570_v61  ;;  %v1551_v21 = vxor.u32 %v1519_v19, %v1487_v36 }
 0x1f7   :  { %v1479_v63 = vmul.u32 2221713035, %v1447_v5  ;;  %v820_v9 = vsel %vm2914_vm6, %v819_v59, %v815_v42  ;;  %v824_v31 = vsub.f32 1.0, %v823_v27  ;;  %1996 = vrcp.f32 %v2932_v53 }
 0x1f8   :  { %v821_v18 = vmul.f32 1.1111112, %v820_v9  ;;  %v1384_v6 = vmul.u32 2146121005, %v1352_v0  ;;  %v1214_v44 = vmul.u32 128, %v1144_v50  ;;  %v1857_v56 = vxor.u32 2147483648, %v1551_v21 }
 0x1f9   :  { %v1511_v45 = vshrl.u32 %v1479_v63, 16  ;;  %v825_v54 = vmul.f32 %v1995_v39, %v824_v31  ;;  %vm828_vm12 = vweird.f32 %v1995_v39  ;;  %vm2939_vm13 = vcmp.eq.f32.partialorder %v831_v37, 8.507059e+37 }
 0x1fa   :  { %v1416_v12 = vshrl.u32 %v1384_v6, 15  ;;  %v834_v20 = vor.u32 1.1754944e-38, %v833_v28  ;;  %v1246_v48 = vadd.s32 %v1214_v44, %v2575_v26  ;;  %vm1621_vm14 = vcmp.ge.s32.totalorder %v1857_v56, 2576980378  ;;  %vm829_vm15 = vmor %vm827_vm10, %vm828_vm12 }
 0x1fb   :  { %v1543_v58 = vxor.u32 %v1511_v45, %v1479_v63  ;;  %v1671_v29 = vmul.f32 %v2510_v10, %v821_v18  ;;  %v826_v60 = vadd.f32 %v1995_v39, %v825_v54  ;;  %v1711_v62 = vsel %vm1621_vm14, %v1679_v49, 0.0 }
 0x1fc   :  { %v1448_v43 = vxor.u32 %v1416_v12, %v1384_v6  ;;  %v1280_v25 = vadd.s32 %v2587_v55, %v1246_v48  ;;  %v711_v14 = vand.u32 2147483647, %v2932_v53  ;;  %1743 = vst [vmem:[#allocation4 + $0x90] sm:$0xff] %v1711_v62  ;;  %v713_v16 = vand.u32 2147483648, %v2932_v53 }
 0x1fd   :  { %v1849_v57 = vxor.u32 2147483648, %v1543_v58  ;;  %v830_v41 = vsel %vm829_vm15, %v1995_v39, %v826_v60  ;;  %v1198_v3 = vadd.s32 128, %v1144_v50  ;;  %v1997_v4 = vpop.eup %1996  ;;  %1998 = vrcp.f32 %v2945_v17 }
 0x1fe   :  { %v1480_v10 = vmul.u32 2221713035, %v1448_v43  ;;  %v835_v13 = vsel %vm2939_vm13, %v834_v20, %v830_v41  ;;  %v1312_v35 = vshrl.u32 %v1280_v25, 16  ;;  %v703_v59 = vmul.f32 %v1997_v4, %v2932_v53 }
 0x1ff   :  { %vm1597_vm0 = vcmp.ge.s32.totalorder %v1849_v57, 2576980378  ;;  %v836_v15 = vmul.f32 1.1111112, %v835_v13  ;;  %vm707_vm1 = vweird.f32 %v2932_v53  ;;  %v1230_v36 = vmul.u32 128, %v1198_v3  ;;  %v2987_v57 = vpop.xlane.xlu2 %647 }
 0x200   :  { %v1703_v8 = vsel %vm1597_vm0, %v1671_v29, 0.0  ;;  %v1512_v33 = vshrl.u32 %v1480_v10, 16  ;;  %v1344_v11 = vxor.u32 %v1312_v35, %v1280_v25  ;;  %v704_v52 = vsub.f32 1.0, %v703_v59 }
 0x201   :  { %1735 = vst [vmem:[#allocation4 + $0x50] sm:$0xff] %v1703_v8  ;;  %vm708_vm2 = vweird.f32 %v1997_v4  ;;  %vm2959_vm3 = vcmp.eq.f32.partialorder %v711_v14, 8.507059e+37  ;;  %v714_v2 = vor.u32 1.1754944e-38, %v713_v16  ;;  %v1262_v37 = vadd.s32 %v1230_v36, %v2575_v26 }
 0x202   :  { %v1544_v32 = vxor.u32 %v1512_v33, %v1480_v10  ;;  %v1376_v22 = vmul.u32 2146121005, %v1344_v11  ;;  %v951_v19 = vand.u32 2147483647, %v2945_v17  ;;  %v1672_v5 = vmul.f32 %v2520_v23, %v836_v15  ;;  %vm709_vm6 = vmor %vm707_vm1, %vm708_vm2 }
 0x203   :  { %v705_v27 = vmul.f32 %v1997_v4, %v704_v52  ;;  %v2967_v28 = vadd.s32 32, %v2570_v61  ;;  %2000 = vrcp.f32 %v2957_v7  ;;  %v1999_v49 = vpop.eup %1998  ;;  %v1296_v50 = vadd.s32 %v2587_v55, %v1262_v37 }
 0x204   :  { %v1850_v42 = vxor.u32 2147483648, %v1544_v32  ;;  %v1408_v0 = vshrl.u32 %v1376_v22, 15  ;;  %v953_v21 = vand.u32 2147483648, %v2945_v17  ;;  %v943_v9 = vmul.f32 %v1999_v49, %v2945_v17 }
 0x205   :  { %v706_v63 = vadd.f32 %v1997_v4, %v705_v27  ;;  %vm947_vm4 = vweird.f32 %v2945_v17  ;;  %v1199_v23 = vadd.s32 128, %v2967_v28  ;;  %v1328_v18 = vshrl.u32 %v1296_v50, 16 }
 0x206   :  { %vm1600_vm5 = vcmp.ge.s32.totalorder %v1850_v42, 2576980378  ;;  %v1440_v31 = vxor.u32 %v1408_v0, %v1376_v22  ;;  %vm2978_vm7 = vcmp.eq.f32.partialorder %v951_v19, 8.507059e+37  ;;  %v944_v45 = vsub.f32 1.0, %v943_v9 }
 0x207   :  { %v1704_v44 = vsel %vm1600_vm5, %v1672_v5, 0.0  ;;  %v710_v56 = vsel %vm709_vm6, %v1997_v4, %v706_v63  ;;  %v1231_v54 = vmul.u32 128, %v1199_v23  ;;  %v1360_v20 = vxor.u32 %v1328_v18, %v1296_v50  ;;  %v3009_v63 = vpop.xlane.xlu0 %601 }
 0x208   :  { %1736 = vst [vmem:[#allocation4 + $0x58] sm:$0xff] %v1704_v44  ;;  %v1472_v12 = vmul.u32 2221713035, %v1440_v31  ;;  %v715_v38 = vsel %vm2959_vm3, %v714_v2, %v710_v56  ;;  %v954_v48 = vor.u32 1.1754944e-38, %v953_v21  ;;  %v945_v53 = vmul.f32 %v1999_v49, %v944_v45 }
 0x209   :  { %v2001_v58 = vpop.eup %2000  ;;  %v716_v29 = vmul.f32 1.1111112, %v715_v38  ;;  %vm948_vm8 = vweird.f32 %v1999_v49  ;;  %v1263_v60 = vadd.s32 %v1231_v54, %v2575_v26  ;;  %v1392_v43 = vmul.u32 2146121005, %v1360_v20 }
 0x20a   :  { %v1504_v62 = vshrl.u32 %v1472_v12, 16  ;;  %v958_v25 = vmul.f32 %v2001_v58, %v2957_v7  ;;  %v966_v14 = vand.u32 2147483647, %v2957_v7  ;;  %v946_v41 = vadd.f32 %v1999_v49, %v945_v53  ;;  %vm949_vm10 = vmor %vm947_vm4, %vm948_vm8  ;;  %v3023_v53 = vpop.xlane.xlu1 %603 }
 0x20b   :  { %v1297_v16 = vadd.s32 %v2587_v55, %v1263_v60  ;;  %vm963_vm9 = vweird.f32 %v2001_v58  ;;  %v968_v3 = vand.u32 2147483648, %v2957_v7  ;;  %v1664_v10 = vmul.f32 %v2522_v24, %v716_v29 }
 0x20c   :  { %v1536_v4 = vxor.u32 %v1504_v62, %v1472_v12  ;;  %v1424_v13 = vshrl.u32 %v1392_v43, 15  ;;  %v959_v35 = vsub.f32 1.0, %v958_v25  ;;  %v950_v15 = vsel %vm949_vm10, %v1999_v49, %v946_v41 }
 0x20d   :  { %v1329_v59 = vshrl.u32 %v1297_v16, 16  ;;  %v1206_v8 = vadd.s32 128, %v2908_v46  ;;  %2002 = vrcp.f32 %v2987_v57  ;;  %v955_v36 = vsel %vm2978_vm7, %v954_v48, %v950_v15 }
 0x20e   :  { %v1842_v33 = vxor.u32 2147483648, %v1536_v4  ;;  %v1456_v11 = vxor.u32 %v1424_v13, %v1392_v43  ;;  %v960_v52 = vmul.f32 %v2001_v58, %v959_v35  ;;  %vm962_vm11 = vweird.f32 %v2957_v7 }
 0x20f   :  { %v1361_v39 = vxor.u32 %v1329_v59, %v1297_v16  ;;  %v1238_v24 = vmul.u32 128, %v1206_v8  ;;  %vm2999_vm13 = vcmp.eq.f32.partialorder %v966_v14, 8.507059e+37  ;;  %v956_v22 = vmul.f32 1.1111112, %v955_v36  ;;  %vm964_vm14 = vmor %vm962_vm11, %vm963_vm9 }
 0x210   :  { %vm1576_vm12 = vcmp.ge.s32.totalorder %v1842_v33, 2576980378  ;;  %v1488_v17 = vmul.u32 2221713035, %v1456_v11  ;;  %v961_v2 = vadd.f32 %v2001_v58, %v960_v52  ;;  %v969_v49 = vor.u32 1.1754944e-38, %v968_v3 }
 0x211   :  { %v1696_v46 = vsel %vm1576_vm12, %v1664_v10, 0.0  ;;  %v1393_v37 = vmul.u32 2146121005, %v1361_v39  ;;  %v1270_v19 = vadd.s32 %v1238_v24, %v2575_v26  ;;  %v1071_v7 = vand.u32 2147483647, %v2987_v57 }
 0x212   :  { %1728 = vst [vmem:[#allocation4 + $0x18] sm:$0xff] %v1696_v46  ;;  %v1520_v5 = vshrl.u32 %v1488_v17, 16  ;;  %v965_v27 = vsel %vm964_vm14, %v2001_v58, %v961_v2  ;;  %vm1067_vm15 = vweird.f32 %v2987_v57  ;;  %v1215_v21 = vmul.u32 128, %v2967_v28 }
 0x213   :  { %v2003_v42 = vpop.eup %2002  ;;  %v1425_v0 = vshrl.u32 %v1393_v37, 15  ;;  %v1304_v50 = vadd.s32 %v2587_v55, %v1270_v19  ;;  %v970_v23 = vsel %vm2999_vm13, %v969_v49, %v965_v27  ;;  %v1073_v18 = vand.u32 2147483648, %v2987_v57 }
 0x214   :  { %v1552_v9 = vxor.u32 %v1520_v5, %v1488_v17  ;;  %v1063_v31 = vmul.f32 %v2003_v42, %v2987_v57  ;;  %v1680_v6 = vmul.f32 %v2529_v30, %v956_v22  ;;  %v1247_v45 = vadd.s32 %v1215_v21, %v2575_v26 }
 0x215   :  { %v1457_v44 = vxor.u32 %v1425_v0, %v1393_v37  ;;  %v1336_v56 = vshrl.u32 %v1304_v50, 16  ;;  %vm3017_vm0 = vcmp.eq.f32.partialorder %v1071_v7, 8.507059e+37  ;;  %2004 = vrcp.f32 %v3009_v63 }
 0x216   :  { %v1858_v54 = vxor.u32 2147483648, %v1552_v9  ;;  %v1064_v12 = vsub.f32 1.0, %v1063_v31  ;;  %v971_v20 = vmul.f32 1.1111112, %v970_v23  ;;  %v1281_v58 = vadd.s32 %v2587_v55, %v1247_v45 }
 0x217   :  { %v1489_v38 = vmul.u32 2221713035, %v1457_v44  ;;  %v1368_v48 = vxor.u32 %v1336_v56, %v1304_v50  ;;  %vm1068_vm2 = vweird.f32 %v2003_v42  ;;  %v1074_v30 = vor.u32 1.1754944e-38, %v1073_v18 }
 0x218   :  { %vm1624_vm1 = vcmp.ge.s32.totalorder %v1858_v54, 2576980378  ;;  %v1065_v29 = vmul.f32 %v2003_v42, %v1064_v12  ;;  %v1313_v25 = vshrl.u32 %v1281_v58, 16  ;;  %v726_v41 = vand.u32 2147483647, %v3009_v63  ;;  %vm1069_vm3 = vmor %vm1067_vm15, %vm1068_vm2 }
 0x219   :  { %v1712_v60 = vsel %vm1624_vm1, %v1680_v6, 0.0  ;;  %v1521_v62 = vshrl.u32 %v1489_v38, 16  ;;  %v1400_v43 = vmul.u32 2146121005, %v1368_v48  ;;  %v728_v16 = vand.u32 2147483648, %v3009_v63 }
 0x21a   :  { %1744 = vst [vmem:[#allocation4 + $0x98] sm:$0xff] %v1712_v60  ;;  %v1066_v14 = vadd.f32 %v2003_v42, %v1065_v29  ;;  %v3028_v3 = vadd.s32 40, %v2570_v61  ;;  %v1345_v13 = vxor.u32 %v1313_v25, %v1281_v58  ;;  %2006 = vrcp.f32 %v3023_v53 }
 0x21b   :  { %v1553_v4 = vxor.u32 %v1521_v62, %v1489_v38  ;;  %v1432_v10 = vshrl.u32 %v1400_v43, 15  ;;  %v2005_v35 = vpop.eup %2004  ;;  %v1681_v15 = vmul.f32 %v2531_v47, %v971_v20  ;;  %vm722_vm4 = vweird.f32 %v3009_v63 }
 0x21c   :  { %v1070_v59 = vsel %vm1069_vm3, %v2003_v42, %v1066_v14  ;;  %v1216_v8 = vmul.u32 128, %v3028_v3  ;;  %v1377_v52 = vmul.u32 2146121005, %v1345_v13  ;;  %v718_v57 = vmul.f32 %v2005_v35, %v3009_v63  ;;  %v3048_v42 = vpop.xlane.xlu2 %617 }
 0x21d   :  { %v1859_v33 = vxor.u32 2147483648, %v1553_v4  ;;  %v1464_v11 = vxor.u32 %v1432_v10, %v1400_v43  ;;  %v1075_v36 = vsel %vm3017_vm0, %v1074_v30, %v1070_v59  ;;  %vm3039_vm5 = vcmp.eq.f32.partialorder %v726_v41, 8.507059e+37 }
 0x21e   :  { %v1076_v39 = vmul.f32 1.1111112, %v1075_v36  ;;  %v1248_v47 = vadd.s32 %v1216_v8, %v2575_v26  ;;  %v1409_v2 = vshrl.u32 %v1377_v52, 15  ;;  %v729_v32 = vor.u32 1.1754944e-38, %v728_v16  ;;  %v3064_v8 = vpop.xlane.xlu0 %649 }
 0x21f   :  { %vm1627_vm6 = vcmp.ge.s32.totalorder %v1859_v33, 2576980378  ;;  %v1496_v17 = vmul.u32 2221713035, %v1464_v11  ;;  %v719_v22 = vsub.f32 1.0, %v718_v57  ;;  %vm737_vm7 = vweird.f32 %v3023_v53 }
 0x220   :  { %v1713_v46 = vsel %vm1627_vm6, %v1681_v15, 0.0  ;;  %v1282_v37 = vadd.s32 %v2587_v55, %v1248_v47  ;;  %v2007_v19 = vpop.eup %2006  ;;  %v1441_v27 = vxor.u32 %v1409_v2, %v1377_v52  ;;  %v741_v49 = vand.u32 2147483647, %v3023_v53 }
 0x221   :  { %1745 = vst [vmem:[#allocation4 + $0xa0] sm:$0xff] %v1713_v46  ;;  %v1528_v5 = vshrl.u32 %v1496_v17, 16  ;;  %v1153_v7 = vadd.s32 96, %v2570_v61  ;;  %v720_v0 = vmul.f32 %v2005_v35, %v719_v22  ;;  %vm723_vm8 = vweird.f32 %v2005_v35 }
 0x222   :  { %v1314_v50 = vshrl.u32 %v1282_v37, 16  ;;  %v733_v21 = vmul.f32 %v2007_v19, %v3023_v53  ;;  %v1688_v23 = vmul.f32 %v2534_v34, %v1076_v39  ;;  %v1473_v31 = vmul.u32 2221713035, %v1441_v27  ;;  %vm724_vm9 = vmor %vm722_vm4, %vm723_vm8 }
 0x223   :  { %v1560_v9 = vxor.u32 %v1528_v5, %v1496_v17  ;;  %v1223_v18 = vmul.u32 128, %v1153_v7  ;;  %v721_v6 = vadd.f32 %v2005_v35, %v720_v0  ;;  %2008 = vrcp.f32 %v3048_v42 }
 0x224   :  { %v1346_v44 = vxor.u32 %v1314_v50, %v1282_v37  ;;  %v734_v56 = vsub.f32 1.0, %v733_v21  ;;  %v1505_v54 = vshrl.u32 %v1473_v31, 16  ;;  %v743_v12 = vand.u32 2147483648, %v3023_v53 }
 0x225   :  { %v1866_v45 = vxor.u32 2147483648, %v1560_v9  ;;  %v1255_v28 = vadd.s32 %v1223_v18, %v2575_v26  ;;  %v725_v38 = vsel %vm724_vm9, %v2005_v35, %v721_v6  ;;  %vm738_vm10 = vweird.f32 %v2007_v19 }
 0x226   :  { %v1378_v20 = vmul.u32 2146121005, %v1346_v44  ;;  %v735_v48 = vmul.f32 %v2007_v19, %v734_v56  ;;  %v1537_v34 = vxor.u32 %v1505_v54, %v1473_v31  ;;  %v730_v58 = vsel %vm3039_vm5, %v729_v32, %v725_v38  ;;  %vm739_vm12 = vmor %vm737_vm7, %vm738_vm10 }
 0x227   :  { %vm1648_vm11 = vcmp.ge.s32.totalorder %v1866_v45, 2576980378  ;;  %v1289_v29 = vadd.s32 %v2587_v55, %v1255_v28  ;;  %v731_v60 = vmul.f32 1.1111112, %v730_v58  ;;  %vm742_vm13 = vcmp.eq.f32.partialorder %v741_v49, 8.507059e+37 }
 0x228   :  { %v1720_v30 = vsel %vm1648_vm11, %v1688_v23, 0.0  ;;  %v1410_v62 = vshrl.u32 %v1378_v20, 15  ;;  %v736_v63 = vadd.f32 %v2007_v19, %v735_v48  ;;  %v1843_v43 = vxor.u32 2147483648, %v1537_v34 }
 0x229   :  { %1752 = vst [vmem:[#allocation4 + $0xd8] sm:$0xff] %v1720_v30  ;;  %v744_v25 = vor.u32 1.1754944e-38, %v743_v12  ;;  %v1321_v14 = vshrl.u32 %v1289_v29, 16  ;;  %v2009_v41 = vpop.eup %2008  ;;  %v1665_v16 = vmul.f32 %v2540_v40, %v731_v60  ;;  %v1207_v13 = vadd.s32 128, %v1153_v7  ;;  %v3067_v40 = vpop.xlane.xlu2 %635  ;;  %v3369_v12 = vld [vmem:[#allocation8_spill] sm:$0xff] }
 0x22a   :  { %v1442_v4 = vxor.u32 %v1410_v62, %v1378_v20  ;;  %v740_v10 = vsel %vm739_vm12, %v2007_v19, %v736_v63  ;;  %vm1579_vm14 = vcmp.ge.s32.totalorder %v1843_v43, 2576980378  ;;  %v838_v59 = vmul.f32 %v2009_v41, %v3048_v42  ;;  %v3092_v30 = vpop.xlane.xlu0 %619 }
 0x22b   :  { %v745_v35 = vsel %vm742_vm13, %v744_v25, %v740_v10  ;;  %v1353_v15 = vxor.u32 %v1321_v14, %v1289_v29  ;;  %v1697_v33 = vsel %vm1579_vm14, %v1665_v16, 0.0  ;;  %v848_v36 = vand.u32 2147483648, %v3048_v42 }
 0x22c   :  { %v1474_v11 = vmul.u32 2221713035, %v1442_v4  ;;  %v746_v53 = vmul.f32 1.1111112, %v745_v35  ;;  %1729 = vst [vmem:[#allocation4 + $0x20] sm:$0xff] %v1697_v33  ;;  %v839_v39 = vsub.f32 1.0, %v838_v59  ;;  %vm842_vm15 = vweird.f32 %v3048_v42 }
 0x22d   :  { %v1385_v52 = vmul.u32 2146121005, %v1353_v15  ;;  %v1239_v57 = vmul.u32 128, %v1207_v13  ;;  %v846_v47 = vand.u32 2147483647, %v3048_v42  ;;  %2010 = vrcp.f32 %v3064_v8 }
 0x22e   :  { %v1506_v24 = vshrl.u32 %v1474_v11, 16  ;;  %v840_v2 = vmul.f32 %v2009_v41, %v839_v39  ;;  %vm843_vm0 = vweird.f32 %v2009_v41  ;;  %v849_v22 = vor.u32 1.1754944e-38, %v848_v36 }
 0x22f   :  { %v1417_v17 = vshrl.u32 %v1385_v52, 15  ;;  %v1271_v32 = vadd.s32 %v1239_v57, %v2575_v26  ;;  %v1200_v37 = vadd.s32 128, %v3028_v3  ;;  %2012 = vrcp.f32 %v3067_v40  ;;  %vm844_vm1 = vmor %vm842_vm15, %vm843_vm0 }
 0x230   :  { %v1538_v46 = vxor.u32 %v1506_v24, %v1474_v11  ;;  %v1666_v19 = vmul.f32 %v2542_v1, %v746_v53  ;;  %v841_v27 = vadd.f32 %v2009_v41, %v840_v2  ;;  %v1086_v0 = vand.u32 2147483647, %v3064_v8 }
 0x231   :  { %v1449_v5 = vxor.u32 %v1417_v17, %v1385_v52  ;;  %v1305_v49 = vadd.s32 %v2587_v55, %v1271_v32  ;;  %v1088_v50 = vand.u32 2147483648, %v3064_v8  ;;  %v1232_v21 = vmul.u32 128, %v1200_v37 }
 0x232   :  { %v1844_v7 = vxor.u32 2147483648, %v1538_v46  ;;  %v845_v23 = vsel %vm844_vm1, %v2009_v41, %v841_v27  ;;  %vm847_vm2 = vcmp.eq.f32.partialorder %v846_v47, 8.507059e+37  ;;  %vm1082_vm4 = vweird.f32 %v3064_v8  ;;  %v3115_v27 = vpop.xlane.xlu1 %621 }
 0x233   :  { %v1481_v9 = vmul.u32 2221713035, %v1449_v5  ;;  %v1337_v3 = vshrl.u32 %v1305_v49, 16  ;;  %v2011_v31 = vpop.eup %2010  ;;  %v850_v1 = vsel %vm847_vm2, %v849_v22, %v845_v23  ;;  %v1264_v18 = vadd.s32 %v1232_v21, %v2575_v26 }
 0x234   :  { %vm1582_vm3 = vcmp.ge.s32.totalorder %v1844_v7, 2576980378  ;;  %v851_v42 = vmul.f32 1.1111112, %v850_v1  ;;  %v1078_v54 = vmul.f32 %v2011_v31, %v3064_v8  ;;  %vm3084_vm5 = vcmp.eq.f32.partialorder %v1086_v0, 8.507059e+37 }
 0x235   :  { %v1698_v6 = vsel %vm1582_vm3, %v1666_v19, 0.0  ;;  %v1513_v44 = vshrl.u32 %v1481_v9, 16  ;;  %v1369_v56 = vxor.u32 %v1337_v3, %v1305_v49  ;;  %v2013_v45 = vpop.eup %2012  ;;  %v1089_v28 = vor.u32 1.1754944e-38, %v1088_v50  ;;  %v3368_v49 = vld [vmem:[#allocation7_spill] sm:$0xff] }
 0x236   :  { %1730 = vst [vmem:[#allocation4 + $0x28] sm:$0xff] %v1698_v6  ;;  %v1298_v38 = vadd.s32 %v2587_v55, %v1264_v18  ;;  %v981_v20 = vand.u32 2147483647, %v3067_v40  ;;  %v973_v58 = vmul.f32 %v2013_v45, %v3067_v40  ;;  %v983_v29 = vand.u32 2147483648, %v3067_v40 }
 0x237   :  { %v1545_v48 = vxor.u32 %v1513_v44, %v1481_v9  ;;  %v1401_v34 = vmul.u32 2146121005, %v1369_v56  ;;  %v1673_v60 = vmul.f32 %v2545_v51, %v851_v42  ;;  %v1079_v62 = vsub.f32 1.0, %v1078_v54  ;;  %v3122_v56 = vpop.xlane.xlu2 %605 }
 0x238   :  { %vm1083_vm6 = vweird.f32 %v2011_v31  ;;  %v1330_v63 = vshrl.u32 %v1298_v38, 16  ;;  %v974_v14 = vsub.f32 1.0, %v973_v58  ;;  %v3096_v41 = vadd.s32 104, %v2570_v61 }
 0x239   :  { %v1851_v43 = vxor.u32 2147483648, %v1545_v48  ;;  %v1433_v25 = vshrl.u32 %v1401_v34, 15  ;;  %v1080_v16 = vmul.f32 %v2011_v31, %v1079_v62  ;;  %vm978_vm7 = vweird.f32 %v2013_v45  ;;  %vm1084_vm10 = vmor %vm1082_vm4, %vm1083_vm6 }
 0x23a   :  { %v1362_v4 = vxor.u32 %v1330_v63, %v1298_v38  ;;  %2014 = vrcp.f32 %v3092_v30  ;;  %v975_v13 = vmul.f32 %v2013_v45, %v974_v14  ;;  %v1224_v35 = vmul.u32 128, %v3096_v41 }
 0x23b   :  { %vm1603_vm8 = vcmp.ge.s32.totalorder %v1851_v43, 2576980378  ;;  %v1465_v10 = vxor.u32 %v1433_v25, %v1401_v34  ;;  %v1081_v15 = vadd.f32 %v2011_v31, %v1080_v16  ;;  %vm977_vm9 = vweird.f32 %v3067_v40 }
 0x23c   :  { %v1705_v51 = vsel %vm1603_vm8, %v1673_v60, 0.0  ;;  %v1394_v59 = vmul.u32 2146121005, %v1362_v4  ;;  %v976_v11 = vadd.f32 %v2013_v45, %v975_v13  ;;  %vm982_vm11 = vcmp.eq.f32.partialorder %v981_v20, 8.507059e+37  ;;  %vm979_vm12 = vmor %vm977_vm9, %vm978_vm7 }
 0x23d   :  { %1737 = vst [vmem:[#allocation4 + $0x60] sm:$0xff] %v1705_v51  ;;  %v1497_v33 = vmul.u32 2221713035, %v1465_v10  ;;  %v1256_v53 = vadd.s32 %v1224_v35, %v2575_v26  ;;  %v1085_v36 = vsel %vm1084_vm10, %v2011_v31, %v1081_v15  ;;  %v984_v39 = vor.u32 1.1754944e-38, %v983_v29  ;;  %v3138_v51 = vpop.xlane.xlu0 %637 }
 0x23e   :  { %v1426_v52 = vshrl.u32 %v1394_v59, 15  ;;  %v3107_v57 = vadd.s32 112, %v2570_v61  ;;  %v1090_v40 = vsel %vm3084_vm5, %v1089_v28, %v1085_v36  ;;  %v980_v47 = vsel %vm979_vm12, %v2013_v45, %v976_v11 }
 0x23f   :  { %v1529_v24 = vshrl.u32 %v1497_v33, 16  ;;  %v1290_v8 = vadd.s32 %v2587_v55, %v1256_v53  ;;  %v1091_v2 = vmul.f32 1.1111112, %v1090_v40  ;;  %v985_v46 = vsel %vm982_vm11, %v984_v39, %v980_v47  ;;  %v3177_v35 = vpop.xlane.xlu2 %623 }
 0x240   :  { %v2015_v17 = vpop.eup %2014  ;;  %v1458_v32 = vxor.u32 %v1426_v52, %v1394_v59  ;;  %v863_v22 = vand.u32 2147483648, %v3092_v30  ;;  %vm857_vm13 = vweird.f32 %v3092_v30  ;;  %v986_v50 = vmul.f32 1.1111112, %v985_v46  ;;  %v3372_v46 = vld [vmem:[#allocation9_spill] sm:$0xff] }
 0x241   :  { %v1561_v37 = vxor.u32 %v1529_v24, %v1497_v33  ;;  %v1322_v19 = vshrl.u32 %v1290_v8, 16  ;;  %v853_v5 = vmul.f32 %v2015_v17, %v3092_v30  ;;  %v1689_v7 = vmul.f32 %v3368_v49, %v1091_v2 }
 0x242   :  { %v1490_v0 = vmul.u32 2221713035, %v1458_v32  ;;  %v1225_v21 = vmul.u32 128, %v3107_v57  ;;  %v861_v31 = vand.u32 2147483647, %v3092_v30  ;;  %v864_v18 = vor.u32 1.1754944e-38, %v863_v22 }
 0x243   :  { %v1867_v9 = vxor.u32 2147483648, %v1561_v37  ;;  %v1354_v23 = vxor.u32 %v1322_v19, %v1290_v8  ;;  %v854_v3 = vsub.f32 1.0, %v853_v5  ;;  %2016 = vrcp.f32 %v3115_v27 }
 0x244   :  { %v1522_v1 = vshrl.u32 %v1490_v0, 16  ;;  %v1257_v6 = vadd.s32 %v1225_v21, %v2575_v26  ;;  %vm858_vm15 = vweird.f32 %v2015_v17  ;;  %v1682_v28 = vmul.f32 %v3369_v12, %v986_v50 }
 0x245   :  { %vm1651_vm14 = vcmp.ge.s32.totalorder %v1867_v9, 2576980378  ;;  %v1386_v44 = vmul.u32 2146121005, %v1354_v23  ;;  %v855_v42 = vmul.f32 %v2015_v17, %v854_v3  ;;  %v876_v34 = vand.u32 2147483647, %v3115_v27  ;;  %vm859_vm0 = vmor %vm857_vm13, %vm858_vm15 }
 0x246   :  { %v1721_v45 = vsel %vm1651_vm14, %v1689_v7, 0.0  ;;  %v1554_v54 = vxor.u32 %v1522_v1, %v1490_v0  ;;  %v1291_v38 = vadd.s32 %v2587_v55, %v1257_v6  ;;  %v1147_v58 = vadd.s32 48, %v2570_v61 }
 0x247   :  { %1753 = vst [vmem:[#allocation4 + $0xe0] sm:$0xff] %v1721_v45  ;;  %v1418_v20 = vshrl.u32 %v1386_v44, 15  ;;  %v856_v48 = vadd.f32 %v2015_v17, %v855_v42  ;;  %v878_v62 = vand.u32 2147483648, %v3115_v27  ;;  %2018 = vrcp.f32 %v3122_v56 }
 0x248   :  { %v1860_v29 = vxor.u32 2147483648, %v1554_v54  ;;  %v1323_v60 = vshrl.u32 %v1291_v38, 16  ;;  %vm862_vm1 = vcmp.eq.f32.partialorder %v861_v31, 8.507059e+37  ;;  %v1217_v25 = vmul.u32 128, %v1147_v58 }
 0x249   :  { %v1450_v63 = vxor.u32 %v1418_v20, %v1386_v44  ;;  %v860_v43 = vsel %vm859_vm0, %v2015_v17, %v856_v48  ;;  %v2017_v14 = vpop.eup %2016  ;;  %vm872_vm3 = vweird.f32 %v3115_v27  ;;  %vm3134_vm4 = vcmp.eq.f32.partialorder %v876_v34, 8.507059e+37  ;;  %v3375_v34 = vld [vmem:[#allocation10_spill] sm:$0xff] }
 0x24a   :  { %vm1630_vm2 = vcmp.ge.s32.totalorder %v1860_v29, 2576980378  ;;  %v865_v16 = vsel %vm862_vm1, %v864_v18, %v860_v43  ;;  %v1355_v4 = vxor.u32 %v1323_v60, %v1291_v38  ;;  %v868_v30 = vmul.f32 %v2017_v14, %v3115_v27 }
 0x24b   :  { %v1714_v10 = vsel %vm1630_vm2, %v1682_v28, 0.0  ;;  %v1482_v13 = vmul.u32 2221713035, %v1450_v63  ;;  %v866_v15 = vmul.f32 1.1111112, %v865_v16  ;;  %v879_v33 = vor.u32 1.1754944e-38, %v878_v62  ;;  %v3166_v63 = vpop.xlane.xlu1 %639 }
 0x24c   :  { %1746 = vst [vmem:[#allocation4 + $0xa8] sm:$0xff] %v1714_v10  ;;  %v1387_v59 = vmul.u32 2146121005, %v1355_v4  ;;  %v1249_v11 = vadd.s32 %v1217_v25, %v2575_v26  ;;  %v869_v36 = vsub.f32 1.0, %v868_v30  ;;  %vm873_vm5 = vweird.f32 %v2017_v14 }
 0x24d   :  { %v1514_v53 = vshrl.u32 %v1482_v13, 16  ;;  %vm752_vm6 = vweird.f32 %v3122_v56  ;;  %v756_v52 = vand.u32 2147483647, %v3122_v56  ;;  %v2019_v39 = vpop.eup %2018  ;;  %v1201_v47 = vadd.s32 128, %v1147_v58  ;;  %vm874_vm8 = vmor %vm872_vm3, %vm873_vm5 }
 0x24e   :  { %v1419_v24 = vshrl.u32 %v1387_v59, 15  ;;  %v1283_v40 = vadd.s32 %v2587_v55, %v1249_v11  ;;  %2020 = vrcp.f32 %v3138_v51  ;;  %v870_v17 = vmul.f32 %v2017_v14, %v869_v36 }
 0x24f   :  { %v1546_v8 = vxor.u32 %v1514_v53, %v1482_v13  ;;  %v748_v2 = vmul.f32 %v2019_v39, %v3122_v56  ;;  %v758_v32 = vand.u32 2147483648, %v3122_v56  ;;  %v1674_v22 = vmul.f32 %v3372_v46, %v866_v15 }
 0x250   :  { %v1451_v37 = vxor.u32 %v1419_v24, %v1387_v59  ;;  %v1315_v19 = vshrl.u32 %v1283_v40, 16  ;;  %v1233_v5 = vmul.u32 128, %v1201_v47  ;;  %v871_v7 = vadd.f32 %v2017_v14, %v870_v17 }
 0x251   :  { %v1852_v49 = vxor.u32 2147483648, %v1546_v8  ;;  %v749_v0 = vsub.f32 1.0, %v748_v2  ;;  %vm3148_vm7 = vcmp.eq.f32.partialorder %v756_v52, 8.507059e+37  ;;  %vm753_vm9 = vweird.f32 %v2019_v39 }
 0x252   :  { %v1483_v21 = vmul.u32 2221713035, %v1451_v37  ;;  %v1347_v9 = vxor.u32 %v1315_v19, %v1283_v40  ;;  %v1265_v23 = vadd.s32 %v1233_v5, %v2575_v26  ;;  %v875_v3 = vsel %vm874_vm8, %v2017_v14, %v871_v7  ;;  %vm754_vm11 = vmor %vm752_vm6, %vm753_vm9 }
 0x253   :  { %vm1606_vm10 = vcmp.ge.s32.totalorder %v1852_v49, 2576980378  ;;  %v750_v31 = vmul.f32 %v2019_v39, %v749_v0  ;;  %v759_v1 = vor.u32 1.1754944e-38, %v758_v32  ;;  %v880_v42 = vsel %vm3134_vm4, %v879_v33, %v875_v3 }
 0x254   :  { %v2021_v18 = vpop.eup %2020  ;;  %v1706_v6 = vsel %vm1606_vm10, %v1674_v22, 0.0  ;;  %v1515_v44 = vshrl.u32 %v1483_v21, 16  ;;  %v1379_v45 = vmul.u32 2146121005, %v1347_v9  ;;  %v881_v54 = vmul.f32 1.1111112, %v880_v42 }
 0x255   :  { %1738 = vst [vmem:[#allocation4 + $0x68] sm:$0xff] %v1706_v6  ;;  %v751_v12 = vadd.f32 %v2019_v39, %v750_v31  ;;  %v1299_v27 = vadd.s32 %v2587_v55, %v1265_v23  ;;  %v988_v28 = vmul.f32 %v2021_v18, %v3138_v51  ;;  %vm992_vm12 = vweird.f32 %v3138_v51  ;;  %v3381_v42 = vld [vmem:[#allocation12_spill] sm:$0xff] }
 0x256   :  { %v1547_v38 = vxor.u32 %v1515_v44, %v1483_v21  ;;  %v1411_v20 = vshrl.u32 %v1379_v45, 15  ;;  %v996_v48 = vand.u32 2147483647, %v3138_v51  ;;  %v1675_v58 = vmul.f32 %v3375_v34, %v881_v54  ;;  %v3201_v44 = vpop.xlane.xlu0 %607 }
 0x257   :  { %v755_v29 = vsel %vm754_vm11, %v2019_v39, %v751_v12  ;;  %v1331_v60 = vshrl.u32 %v1299_v27, 16  ;;  %v989_v62 = vsub.f32 1.0, %v988_v28  ;;  %v998_v16 = vand.u32 2147483648, %v3138_v51  ;;  %v3378_v51 = vld [vmem:[#allocation11_spill] sm:$0xff] }
 0x258   :  { %v1853_v43 = vxor.u32 2147483648, %v1547_v38  ;;  %v1443_v25 = vxor.u32 %v1411_v20, %v1379_v45  ;;  %v760_v14 = vsel %vm3148_vm7, %v759_v1, %v755_v29  ;;  %vm993_vm13 = vweird.f32 %v2021_v18 }
 0x259   :  { %v1363_v56 = vxor.u32 %v1331_v60, %v1299_v27  ;;  %v990_v4 = vmul.f32 %v2021_v18, %v989_v62  ;;  %v1148_v10 = vadd.s32 56, %v2570_v61  ;;  %vm3172_vm15 = vcmp.eq.f32.partialorder %v996_v48, 8.507059e+37  ;;  %vm994_vm0 = vmor %vm992_vm12, %vm993_vm13 }
 0x25a   :  { %vm1609_vm14 = vcmp.ge.s32.totalorder %v1853_v43, 2576980378  ;;  %v1475_v13 = vmul.u32 2221713035, %v1443_v25  ;;  %2022 = vrcp.f32 %v3166_v63  ;;  %v761_v59 = vmul.f32 1.1111112, %v760_v14 }
 0x25b   :  { %v1707_v15 = vsel %vm1609_vm14, %v1675_v58, 0.0  ;;  %v1395_v33 = vmul.u32 2146121005, %v1363_v56  ;;  %v991_v11 = vadd.f32 %v2021_v18, %v990_v4  ;;  %v999_v36 = vor.u32 1.1754944e-38, %v998_v16 }
 0x25c   :  { %1739 = vst [vmem:[#allocation4 + $0x70] sm:$0xff] %v1707_v15  ;;  %v1507_v53 = vshrl.u32 %v1475_v13, 16  ;;  %v1202_v52 = vadd.s32 128, %v1148_v10  ;;  %v1011_v39 = vand.u32 2147483647, %v3166_v63  ;;  %v3183_v47 = vadd.s32 120, %v2570_v61 }
 0x25d   :  { %v1427_v24 = vshrl.u32 %v1395_v33, 15  ;;  %v995_v40 = vsel %vm994_vm0, %v2021_v18, %v991_v11  ;;  %2024 = vrcp.f32 %v3177_v35  ;;  %v1013_v32 = vand.u32 2147483648, %v3166_v63  ;;  %v3388_v15 = vld [vmem:[#allocation15_spill] sm:$0xff] }
 0x25e   :  { %v1539_v8 = vxor.u32 %v1507_v53, %v1475_v13  ;;  %v1000_v17 = vsel %vm3172_vm15, %v999_v36, %v995_v40  ;;  %v1234_v2 = vmul.u32 128, %v1202_v52  ;;  %v1667_v46 = vmul.f32 %v3378_v51, %v761_v59 }
 0x25f   :  { %v1459_v22 = vxor.u32 %v1427_v24, %v1395_v33  ;;  %v1226_v37 = vmul.u32 128, %v3183_v47  ;;  %v1001_v49 = vmul.f32 1.1111112, %v1000_v17  ;;  %vm1007_vm1 = vweird.f32 %v3166_v63 }
 0x260   :  { %v2023_v19 = vpop.eup %2022  ;;  %v1845_v5 = vxor.u32 2147483648, %v1539_v8  ;;  %v1266_v61 = vadd.s32 %v1234_v2, %v2575_v26  ;;  %vm3195_vm3 = vcmp.eq.f32.partialorder %v1011_v39, 8.507059e+37  ;;  %v1014_v9 = vor.u32 1.1754944e-38, %v1013_v32  ;;  %v3225_v2 = vpop.xlane.xlu1 %651 }
 0x261   :  { %v1491_v7 = vmul.u32 2221713035, %v1459_v22  ;;  %v1003_v0 = vmul.f32 %v2023_v19, %v3166_v63  ;;  %v1258_v23 = vadd.s32 %v1226_v37, %v2575_v26  ;;  %v891_v6 = vand.u32 2147483647, %v3177_v35 }
 0x262   :  { %vm1585_vm2 = vcmp.ge.s32.totalorder %v1845_v5, 2576980378  ;;  %v1300_v50 = vadd.s32 %v2587_v55, %v1266_v61  ;;  %v1683_v45 = vmul.f32 %v3381_v42, %v1001_v49  ;;  %vm1008_vm4 = vweird.f32 %v2023_v19 }
 0x263   :  { %v2025_v3 = vpop.eup %2024  ;;  %v1699_v31 = vsel %vm1585_vm2, %v1667_v46, 0.0  ;;  %v1523_v1 = vshrl.u32 %v1491_v7, 16  ;;  %v1004_v18 = vsub.f32 1.0, %v1003_v0  ;;  %v1292_v12 = vadd.s32 %v2587_v55, %v1258_v23  ;;  %vm1009_vm5 = vmor %vm1007_vm1, %vm1008_vm4 }
 0x264   :  { %1731 = vst [vmem:[#allocation4 + $0x30] sm:$0xff] %v1699_v31  ;;  %v1332_v54 = vshrl.u32 %v1300_v50, 16  ;;  %v883_v27 = vmul.f32 %v2025_v3, %v3177_v35  ;;  %v1218_v20 = vmul.u32 128, %v1148_v10  ;;  %2026 = vrcp.f32 %v3201_v44 }
 0x265   :  { %v1555_v28 = vxor.u32 %v1523_v1, %v1491_v7  ;;  %v1005_v38 = vmul.f32 %v2023_v19, %v1004_v18  ;;  %v1324_v34 = vshrl.u32 %v1292_v12, 16  ;;  %v893_v62 = vand.u32 2147483648, %v3177_v35 }
 0x266   :  { %v1364_v48 = vxor.u32 %v1332_v54, %v1300_v50  ;;  %v884_v58 = vsub.f32 1.0, %v883_v27  ;;  %v1250_v43 = vadd.s32 %v1218_v20, %v2575_v26  ;;  %vm887_vm6 = vweird.f32 %v3177_v35  ;;  %v3387_v27 = vld [vmem:[#allocation14_spill] sm:$0xff] }
 0x267   :  { %v1861_v29 = vxor.u32 2147483648, %v1555_v28  ;;  %v1006_v60 = vadd.f32 %v2023_v19, %v1005_v38  ;;  %v1356_v14 = vxor.u32 %v1324_v34, %v1292_v12  ;;  %vm888_vm8 = vweird.f32 %v2025_v3 }
 0x268   :  { %v1396_v25 = vmul.u32 2146121005, %v1364_v48  ;;  %v885_v16 = vmul.f32 %v2025_v3, %v884_v58  ;;  %v1284_v4 = vadd.s32 %v2587_v55, %v1250_v43  ;;  %vm3213_vm9 = vcmp.eq.f32.partialorder %v891_v6, 8.507059e+37  ;;  %vm889_vm10 = vmor %vm887_vm6, %vm888_vm8 }
 0x269   :  { %vm1633_vm7 = vcmp.ge.s32.totalorder %v1861_v29, 2576980378  ;;  %v1010_v56 = vsel %vm1009_vm5, %v2023_v19, %v1006_v60  ;;  %v1388_v30 = vmul.u32 2146121005, %v1356_v14  ;;  %v894_v33 = vor.u32 1.1754944e-38, %v893_v62 }
 0x26a   :  { %v1715_v10 = vsel %vm1633_vm7, %v1683_v45, 0.0  ;;  %v1428_v13 = vshrl.u32 %v1396_v25, 15  ;;  %v1015_v63 = vsel %vm3195_vm3, %v1014_v9, %v1010_v56  ;;  %v886_v59 = vadd.f32 %v2025_v3, %v885_v16  ;;  %v2027_v53 = vpop.eup %2026  ;;  %v3384_v9 = vld [vmem:[#allocation13_spill] sm:$0xff]  ;;  %v3239_v45 = vpop.xlane.xlu2 %653 }
 0x26b   :  { %1747 = vst [vmem:[#allocation4 + $0xb0] sm:$0xff] %v1715_v10  ;;  %v1316_v11 = vshrl.u32 %v1284_v4, 16  ;;  %v1420_v52 = vshrl.u32 %v1388_v30, 15  ;;  %vm767_vm11 = vweird.f32 %v3201_v44  ;;  %v1208_v39 = vadd.s32 128, %v3096_v41 }
 0x26c   :  { %v1460_v36 = vxor.u32 %v1428_v13, %v1396_v25  ;;  %v890_v24 = vsel %vm889_vm10, %v2025_v3, %v886_v59  ;;  %v763_v8 = vmul.f32 %v2027_v53, %v3201_v44  ;;  %v771_v17 = vand.u32 2147483647, %v3201_v44 }
 0x26d   :  { %v1348_v40 = vxor.u32 %v1316_v11, %v1284_v4  ;;  %v1016_v51 = vmul.f32 1.1111112, %v1015_v63  ;;  %v1452_v46 = vxor.u32 %v1420_v52, %v1388_v30  ;;  %v895_v22 = vsel %vm3213_vm9, %v894_v33, %v890_v24  ;;  %v3250_v30 = vpop.xlane.xlu0 %655 }
 0x26e   :  { %v1492_v32 = vmul.u32 2221713035, %v1460_v36  ;;  %v764_v37 = vsub.f32 1.0, %v763_v8  ;;  %v773_v19 = vand.u32 2147483648, %v3201_v44  ;;  %v1240_v5 = vmul.u32 128, %v1208_v39 }
 0x26f   :  { %v1380_v35 = vmul.u32 2146121005, %v1348_v40  ;;  %v1484_v49 = vmul.u32 2221713035, %v1452_v46  ;;  %v896_v61 = vmul.f32 1.1111112, %v895_v22  ;;  %2028 = vrcp.f32 %v3225_v2 }
 0x270   :  { %v1524_v41 = vshrl.u32 %v1492_v32, 16  ;;  %v765_v0 = vmul.f32 %v2027_v53, %v764_v37  ;;  %vm768_vm12 = vweird.f32 %v2027_v53  ;;  %v1272_v50 = vadd.s32 %v1240_v5, %v2575_v26 }
 0x271   :  { %v1412_v7 = vshrl.u32 %v1380_v35, 15  ;;  %v1684_v23 = vmul.f32 %v3384_v9, %v1016_v51  ;;  %v1516_v3 = vshrl.u32 %v1484_v49, 16  ;;  %vm3233_vm13 = vcmp.eq.f32.partialorder %v771_v17, 8.507059e+37  ;;  %vm769_vm14 = vmor %vm767_vm11, %vm768_vm12 }
 0x272   :  { %v1556_v21 = vxor.u32 %v1524_v41, %v1492_v32  ;;  %v766_v18 = vadd.f32 %v2027_v53, %v765_v0  ;;  %v1306_v6 = vadd.s32 %v2587_v55, %v1272_v50  ;;  %v1209_v42 = vadd.s32 128, %v3107_v57 }
 0x273   :  { %v1444_v1 = vxor.u32 %v1412_v7, %v1380_v35  ;;  %v1548_v12 = vxor.u32 %v1516_v3, %v1484_v49  ;;  %v1676_v28 = vmul.f32 %v3387_v27, %v896_v61  ;;  %v774_v38 = vor.u32 1.1754944e-38, %v773_v19 }
 0x274   :  { %v1862_v54 = vxor.u32 2147483648, %v1556_v21  ;;  %v770_v48 = vsel %vm769_vm14, %v2027_v53, %v766_v18  ;;  %v1338_v34 = vshrl.u32 %v1306_v6, 16  ;;  %v1241_v58 = vmul.u32 128, %v1209_v42 }
 0x275   :  { %v1476_v20 = vmul.u32 2221713035, %v1444_v1  ;;  %v2029_v29 = vpop.eup %2028  ;;  %v1854_v60 = vxor.u32 2147483648, %v1548_v12  ;;  %v775_v57 = vsel %vm3233_vm13, %v774_v38, %v770_v48  ;;  %2030 = vrcp.f32 %v3239_v45 }
 0x276   :  { %vm1636_vm15 = vcmp.ge.s32.totalorder %v1862_v54, 2576980378  ;;  %v776_v25 = vmul.f32 1.1111112, %v775_v57  ;;  %v1370_v14 = vxor.u32 %v1338_v34, %v1306_v6  ;;  %v1093_v44 = vmul.f32 %v2029_v29, %v3225_v2  ;;  %v3391_v6 = vld [vmem:[#allocation16_spill] sm:$0xff] }
 0x277   :  { %v1716_v62 = vsel %vm1636_vm15, %v1684_v23, 0.0  ;;  %v1508_v43 = vshrl.u32 %v1476_v20, 16  ;;  %vm1612_vm0 = vcmp.ge.s32.totalorder %v1854_v60, 2576980378  ;;  %v1273_v16 = vadd.s32 %v1241_v58, %v2575_v26 }
 0x278   :  { %1748 = vst [vmem:[#allocation4 + $0xb8] sm:$0xff] %v1716_v62  ;;  %v1708_v56 = vsel %vm1612_vm0, %v1676_v28, 0.0  ;;  %v1402_v10 = vmul.u32 2146121005, %v1370_v14  ;;  %v1101_v13 = vand.u32 2147483647, %v3225_v2  ;;  %v1668_v63 = vmul.f32 %v3388_v15, %v776_v25 }
 0x279   :  { %v1540_v4 = vxor.u32 %v1508_v43, %v1476_v20  ;;  %1740 = vst [vmem:[#allocation4 + $0x78] sm:$0xff] %v1708_v56  ;;  %v1094_v59 = vsub.f32 1.0, %v1093_v44  ;;  %vm1097_vm1 = vweird.f32 %v3225_v2  ;;  %v1307_v33 = vadd.s32 %v2587_v55, %v1273_v16  ;;  %v3392_v14 = vld [vmem:[#allocation17_spill] sm:$0xff] }
 0x27a   :  { %v1434_v53 = vshrl.u32 %v1402_v10, 15  ;;  %v1103_v36 = vand.u32 2147483648, %v3225_v2  ;;  %v1210_v52 = vadd.s32 128, %v3183_v47  ;;  %vm1098_vm2 = vweird.f32 %v2029_v29 }
 0x27b   :  { %v1846_v11 = vxor.u32 2147483648, %v1540_v4  ;;  %v2031_v39 = vpop.eup %2030  ;;  %v1095_v24 = vmul.f32 %v2029_v29, %v1094_v59  ;;  %v1339_v40 = vshrl.u32 %v1307_v33, 16  ;;  %2032 = vrcp.f32 %v3250_v30  ;;  %vm1099_vm5 = vmor %vm1097_vm1, %vm1098_vm2 }
 0x27c   :  { %v1466_v8 = vxor.u32 %v1434_v53, %v1402_v10  ;;  %vm3258_vm4 = vcmp.eq.f32.partialorder %v1101_v13, 8.507059e+37  ;;  %v1108_v32 = vmul.f32 %v2031_v39, %v3239_v45  ;;  %v1116_v35 = vand.u32 2147483647, %v3239_v45 }
 0x27d   :  { %vm1588_vm3 = vcmp.ge.s32.totalorder %v1846_v11, 2576980378  ;;  %v1096_v46 = vadd.f32 %v2029_v29, %v1095_v24  ;;  %v1371_v22 = vxor.u32 %v1339_v40, %v1307_v33  ;;  %v1104_v37 = vor.u32 1.1754944e-38, %v1103_v36 }
 0x27e   :  { %v1700_v51 = vsel %vm1588_vm3, %v1668_v63, 0.0  ;;  %v1498_v47 = vmul.u32 2221713035, %v1466_v8  ;;  %v1109_v19 = vsub.f32 1.0, %v1108_v32  ;;  %v1242_v5 = vmul.u32 128, %v1210_v52 }
 0x27f   :  { %1732 = vst [vmem:[#allocation4 + $0x38] sm:$0xff] %v1700_v51  ;;  %v1100_v41 = vsel %vm1099_vm5, %v2029_v29, %v1096_v46  ;;  %v1403_v49 = vmul.u32 2146121005, %v1371_v22  ;;  %vm1113_vm6 = vweird.f32 %v2031_v39  ;;  %v1118_v61 = vand.u32 2147483648, %v3239_v45 }
 0x280   :  { %v1530_v7 = vshrl.u32 %v1498_v47, 16  ;;  %v1105_v0 = vsel %vm3258_vm4, %v1104_v37, %v1100_v41  ;;  %v1110_v50 = vmul.f32 %v2031_v39, %v1109_v19  ;;  %v1274_v21 = vadd.s32 %v1242_v5, %v2575_v26 }
 0x281   :  { %v2033_v9 = vpop.eup %2032  ;;  %v1106_v23 = vmul.f32 1.1111112, %v1105_v0  ;;  %v1435_v3 = vshrl.u32 %v1403_v49, 15  ;;  %vm1112_vm7 = vweird.f32 %v3239_v45  ;;  %vm1117_vm9 = vcmp.eq.f32.partialorder %v1116_v35, 8.507059e+37 }
 0x282   :  { %v1562_v2 = vxor.u32 %v1530_v7, %v1498_v47  ;;  %v1111_v31 = vadd.f32 %v2031_v39, %v1110_v50  ;;  %v1308_v1 = vadd.s32 %v2587_v55, %v1274_v21  ;;  %v1123_v18 = vmul.f32 %v2033_v9, %v3250_v30  ;;  %vm1114_vm8 = vmor %vm1112_vm7, %vm1113_vm6 }
 0x283   :  { %v1690_v42 = vmul.f32 %v3391_v6, %v1106_v23  ;;  %v1467_v54 = vxor.u32 %v1435_v3, %v1403_v49  ;;  %v1119_v12 = vor.u32 1.1754944e-38, %v1118_v61  ;;  %vm1128_vm10 = vweird.f32 %v2033_v9 }
 0x284   :  { %v1868_v27 = vxor.u32 2147483648, %v1562_v2  ;;  %v1115_v26 = vsel %vm1114_vm8, %v2031_v39, %v1111_v31  ;;  %v1340_v28 = vshrl.u32 %v1308_v1, 16  ;;  %v1124_v38 = vsub.f32 1.0, %v1123_v18 }
 0x285   :  { %v1499_v20 = vmul.u32 2221713035, %v1467_v54  ;;  %v1120_v48 = vsel %vm1117_vm9, %v1119_v12, %v1115_v26  ;;  %v1133_v45 = vand.u32 2147483648, %v3250_v30  ;;  %v1131_v57 = vand.u32 2147483647, %v3250_v30 }
 0x286   :  { %vm1654_vm11 = vcmp.ge.s32.totalorder %v1868_v27, 2576980378  ;;  %v1121_v55 = vmul.f32 1.1111112, %v1120_v48  ;;  %v1372_v34 = vxor.u32 %v1340_v28, %v1308_v1  ;;  %v1125_v58 = vmul.f32 %v2033_v9, %v1124_v38 }
 0x287   :  { %v1722_v29 = vsel %vm1654_vm11, %v1690_v42, 0.0  ;;  %v1531_v60 = vshrl.u32 %v1499_v20, 16  ;;  %vm1127_vm12 = vweird.f32 %v3250_v30  ;;  %v1134_v4 = vor.u32 1.1754944e-38, %v1133_v45  ;;  %v3393_v30 = vld [vmem:[#allocation18_spill] sm:$0xff] }
 0x288   :  { %1754 = vst [vmem:[#allocation4 + $0xe8] sm:$0xff] %v1722_v29  ;;  %v1404_v62 = vmul.u32 2146121005, %v1372_v34  ;;  %v1126_v43 = vadd.f32 %v2033_v9, %v1125_v58  ;;  %vm1129_vm13 = vmor %vm1127_vm12, %vm1128_vm10  ;;  %v1691_v44 = vmul.f32 %v3392_v14, %v1121_v55  ;;  %vm1132_vm14 = vcmp.eq.f32.partialorder %v1131_v57, 8.507059e+37 }
 0x289   :  { %v1563_v25 = vxor.u32 %v1531_v60, %v1499_v20 }
 0x28a   :  { %v1436_v16 = vshrl.u32 %v1404_v62, 15  ;;  %v1130_v56 = vsel %vm1129_vm13, %v2033_v9, %v1126_v43 }
 0x28b   :  { %v1869_v10 = vxor.u32 2147483648, %v1563_v25  ;;  %v1135_v15 = vsel %vm1132_vm14, %v1134_v4, %v1130_v56 }
 0x28c   :  { %v1468_v13 = vxor.u32 %v1436_v16, %v1404_v62  ;;  %v1136_v33 = vmul.f32 1.1111112, %v1135_v15 }
 0x28d   :  { %vm1657_vm15 = vcmp.ge.s32.totalorder %v1869_v10, 2576980378 }
 0x28e   :  { %v1723_v63 = vsel %vm1657_vm15, %v1691_v44, 0.0  ;;  %v1500_v59 = vmul.u32 2221713035, %v1468_v13  ;;  %v1692_v36 = vmul.f32 %v3393_v30, %v1136_v33 }
 0x28f   :  { %1755 = vst [vmem:[#allocation4 + $0xf0] sm:$0xff] %v1723_v63 }
 0x290   :  { %v1532_v11 = vshrl.u32 %v1500_v59, 16 }
 0x292   :  { %v1564_v53 = vxor.u32 %v1532_v11, %v1500_v59 }
 0x294   :  { %v1870_v52 = vxor.u32 2147483648, %v1564_v53 }
 0x296   :  { %vm1660_vm0 = vcmp.ge.s32.totalorder %v1870_v52, 2576980378 }
 0x297   :  { %v1724_v39 = vsel %vm1660_vm0, %v1692_v36, 0.0 }
 0x298   :  { %1756 = vst [vmem:[#allocation4 + $0xf8] sm:$0xff] %v1724_v39 }
 0x299   :  { %1769 = dma.vmem_to_hbm [thread:$0]  %s1762_s30, 4096, %s1764_s6, [#allocation5], %s2061_s7, %s2061_s7, %s2062_s8  }
 0x29a   :  { %2058 = dma.done.wait [#allocation5], 4096  }
 0x29b   :  { %2059 = vsyncadd [#allocation5], 4294963200 }
 0x29c   :  { %1774 = vsyncpa [#allocation5], 1 }

</bundles_post_ra>
